<compile_context>
chip_gen: v6e
topology: v6e:2x2x1
jax: 0.10.0
libtpu: 0.0.40
codegen_flags: <defaults>
</compile_context>

<pallas_src>
import functools

import numpy as np
import jax
import jax.numpy as jnp
from jax.experimental import pallas as pl
from jax.experimental.pallas import tpu as pltpu


# ---------------------------------------------------------------------------
# host-side (glue) precompute: masks / selection / interpolation matrices
# ---------------------------------------------------------------------------
def _bilinear_matrix(out_size, in_size):
    """A (out, in) for align_corners=True bilinear interpolation."""
    A = np.zeros((out_size, in_size), dtype=np.float32)
    if in_size == 1:
        A[:, 0] = 1.0
        return A
    if out_size == 1:
        A[0, 0] = 1.0
        return A
    scale = (in_size - 1) / (out_size - 1)
    for h in range(out_size):
        src = h * scale
        i0 = min(int(np.floor(src)), in_size - 1)
        i1 = min(i0 + 1, in_size - 1)
        frac = src - i0
        A[h, i0] += 1.0 - frac
        A[h, i1] += frac
    return A


def _upsample_matrix(h, w, ph, pw, B):
    """(B*ph*pw, B*h*w) block-diagonal: up_flat = y_flat @ U per batch image."""
    ah = _bilinear_matrix(h, ph)          # (h, ph)
    aw = _bilinear_matrix(w, pw)          # (w, pw)
    u = np.kron(ah, aw).T                 # (ph*pw, h*w)
    return np.kron(np.eye(B, dtype=np.float32), u).astype(np.float32)


def _select_matrix(h, w, k, scale, B):
    """(B*h*w, B*ph*pw) block-diagonal gather of the (i*k, j*k) window anchors."""
    ph, pw = h // k, w // k
    sel = np.zeros((h * w, ph * pw), dtype=np.float32)
    for i in range(ph):
        for j in range(pw):
            sel[(i * k) * w + j * k, i * pw + j] = scale
    return np.kron(np.eye(B, dtype=np.float32), sel).astype(np.float32)


def _tap_masks(p, q, B):
    """(9, B*p*q) validity masks for the 9 zero-padded 3x3 conv taps on a
    row-major flattened (p, q) map, tiled over B lane-concatenated images.
    Also kills circular-roll wrap-around (row / image / batch boundaries)."""
    rows = np.arange(p * q) // q
    cols = np.arange(p * q) % q
    masks = np.empty((9, p * q), dtype=np.float32)
    for dy in range(3):
        for dx in range(3):
            ok_r = np.ones(p * q, bool) if dy == 1 else (rows >= 1 if dy == 0 else rows <= p - 2)
            ok_c = np.ones(p * q, bool) if dx == 1 else (cols >= 1 if dx == 0 else cols <= q - 2)
            masks[dy * 3 + dx] = (ok_r & ok_c).astype(np.float32)
    return np.tile(masks, (1, B))


# ---------------------------------------------------------------------------
# fused Pallas kernel: all pyramid levels + identity branch for a batch block
# ---------------------------------------------------------------------------
def _spp_fused_kernel(*refs, C, CP, H, W, B, ks, pool_type):
    # refs = (x, w_mat, bias, *(per level: mask [, sel, ups]), out)
    x_ref, w_ref, b_ref = refs[0], refs[1], refs[2]
    o_ref = refs[-1]
    lvl_refs = refs[3:-1]

    HW = H * W
    L = B * HW
    f32, bf16 = jnp.float32, jnp.bfloat16
    is_max = (pool_type == 'max_pool')

    # Fold the batch block into the lane axis (lane-aligned copies: HW % 128 == 0)
    # and pad channels to a full 8-sublane tile so each im2col tap is tile-aligned.
    x_cat = jnp.concatenate([x_ref[i] for i in range(B)], axis=-1).astype(f32)
    if CP > C:
        xp = jnp.concatenate([x_cat, jnp.zeros((CP - C, L), f32)], axis=0)
    else:
        xp = x_cat                                            # (CP, B*HW)

    def lane_shift(a, off):
        """out[:, m] = a[:, m + off] up to edge junk that callers mask away.

        Lane-tile-multiple maps use pltpu.roll (XLU slot, no zero-fill VALU /
        ld-st traffic); narrow maps keep a zero-filled slice+concat fallback."""
        n = a.shape[-1]
        if off == 0:
            return a
        if n % 128 == 0:
            return pltpu.roll(a, (-off) % n, axis=1)
        z = jnp.zeros((a.shape[0], abs(off)), a.dtype)
        if off > 0:
            return jnp.concatenate([a[:, off:], z], axis=1)
        return jnp.concatenate([z, a[:, :n + off]], axis=1)

    def im2col(flat, q_lvl, mask_ref):
        """(CP, B*p*q) map -> (9*CP, B*p*q) zero-padded 3x3 'same' patches."""
        masks = mask_ref[...].astype(f32)                     # (9, B*p*q), hoisted
        taps = []
        for dy in range(3):
            for dx in range(3):
                tap = dy * 3 + dx
                t = lane_shift(flat, (dy - 1) * q_lvl + (dx - 1))
                if tap != 4:                                  # centre tap needs no mask
                    t = t * masks[tap:tap + 1, :]
                taps.append(t)
        return jnp.concatenate(taps, axis=0)                  # tile-aligned sublane stack

    # ---- per-level pooled maps and im2col patch blocks ----------------------
    ri = 0
    widths, patch_blocks, ups_list = [], [], []
    for k in ks:
        mask_ref = lvl_refs[ri]
        ri += 1
        if k == 1:
            flat = xp                                         # pool & upsample are identities
            ups_list.append(None)
        else:
            sel_ref, ups_ref = lvl_refs[ri], lvl_refs[ri + 1]
            ri += 2
            ups_list.append(ups_ref)
            # Separable k x k max/avg pooling via circular lane rolls.  Only the
            # (i*k, j*k) anchors are consumed by the selection matmul and
            # H % k == W % k == 0 guarantees they never read a wrapped value.
            rowp = xp
            for kj in range(1, k):
                s = lane_shift(xp, kj)
                rowp = jnp.maximum(rowp, s) if is_max else rowp + s
            win = rowp
            for ki in range(1, k):
                s = lane_shift(rowp, ki * W)
                win = jnp.maximum(win, s) if is_max else win + s
            flat = jnp.dot(win.astype(bf16), sel_ref[...],
                           preferred_element_type=f32)        # (CP, B*ph*pw)
        widths.append(flat.shape[-1])
        patch_blocks.append(im2col(flat, W // k, mask_ref))

    # ---- ONE fused conv matmul + ONE bias/ReLU pass for all levels ----------
    patches = jnp.concatenate(patch_blocks, axis=1).astype(bf16)   # (9*CP, sum pq)
    y = jnp.dot(w_ref[...], patches, preferred_element_type=f32)   # (C, sum pq)
    y = jnp.maximum(y + b_ref[...].astype(f32), 0.0)

    # ---- bilinear upsample (k > 1) and store each branch directly -----------
    col = 0
    for li, k in enumerate(ks):
        yk = y[:, col:col + widths[li]]
        col += widths[li]
        if k > 1:
            yk = jnp.dot(yk.astype(bf16), ups_list[li][...],
                         preferred_element_type=f32)               # (C, B*HW)
        for b in range(B):
            o_ref[b, li * C:(li + 1) * C, :] = (
                yk[:, b * HW:(b + 1) * HW].astype(o_ref.dtype))
    nl = len(ks)
    for b in range(B):                                             # identity branch
        o_ref[b, nl * C:(nl + 1) * C, :] = x_ref[b].astype(o_ref.dtype)


# ---------------------------------------------------------------------------
# SPPLayer.forward equivalent (NCHW in / NCHW out, like PyTorch)
# ---------------------------------------------------------------------------
def spp_forward(x, conv_weight, conv_bias, num_levels=3, pool_type='max_pool',
                batch_block=None):
    static_kernel_size = [1, 2, 4]
    ks = tuple(static_kernel_size[i] for i in range(num_levels))
    n, c, h, w = x.shape
    hw = h * w
    for k in ks:
        assert h % k == 0 and w % k == 0, "pooling anchors require H, W divisible by k"

    B = n if batch_block is None else batch_block               # batch elems per grid step
    assert n % B == 0, "batch must be divisible by batch_block"
    CP = ((c + 7) // 8) * 8                                     # Cin padded per im2col tap

    x_flat = x.reshape(n, c, hw)                                # metadata-only

    # PyTorch (Cout, Cin, 3, 3) -> (Cout, 9*CP), col = (dy*3+dx)*CP + ci (zero padded).
    w_t = jnp.transpose(conv_weight, (0, 2, 3, 1))
    w_t = jnp.pad(w_t, ((0, 0), (0, 0), (0, 0), (0, CP - c)))
    w_mat = w_t.reshape(c, 9 * CP).astype(jnp.bfloat16)
    bias = conv_bias.reshape(c, 1).astype(jnp.float32)

    lvl_arrays, lvl_specs = [], []
    for k in ks:
        ph, pw = h // k, w // k
        pq = B * ph * pw
        lvl_arrays.append(jnp.asarray(_tap_masks(ph, pw, B)))            # (9, pq) f32
        lvl_specs.append(pl.BlockSpec((9, pq), lambda i: (0, 0)))
        if k > 1:
            scale = 1.0 if pool_type == 'max_pool' else 1.0 / (k * k)
            lvl_arrays.append(jnp.asarray(_select_matrix(h, w, k, scale, B),
                                          dtype=jnp.bfloat16))           # (B*hw, pq)
            lvl_arrays.append(jnp.asarray(_upsample_matrix(h, w, ph, pw, B),
                                          dtype=jnp.bfloat16))           # (pq, B*hw)
            lvl_specs.append(pl.BlockSpec((B * hw, pq), lambda i: (0, 0)))
            lvl_specs.append(pl.BlockSpec((pq, B * hw), lambda i: (0, 0)))

    n_out_ch = (len(ks) + 1) * c
    kernel = functools.partial(_spp_fused_kernel, C=c, CP=CP, H=h, W=w, B=B,
                               ks=ks, pool_type=pool_type)

    out_flat = pl.pallas_call(
        kernel,
        out_shape=jax.ShapeDtypeStruct((n, n_out_ch, hw), x.dtype),
        grid_spec=pltpu.PrefetchScalarGridSpec(
            num_scalar_prefetch=0,
            grid=(n // B,),
            in_specs=[
                pl.BlockSpec((B, c, hw), lambda i: (i, 0, 0)),
                pl.BlockSpec((c, 9 * CP), lambda i: (0, 0)),
                pl.BlockSpec((c, 1), lambda i: (0, 0)),
            ] + lvl_specs,
            out_specs=pl.BlockSpec((B, n_out_ch, hw), lambda i: (i, 0, 0)),
        ),
        compiler_params=pltpu.CompilerParams(
            dimension_semantics=("parallel",)),
    )(x_flat, w_mat, bias, *lvl_arrays)

    return out_flat.reshape(n, n_out_ch, h, w)                  # metadata-only


# ---------------------------------------------------------------------------
# pure-JAX reference (for correctness check of the kernel math)
# ---------------------------------------------------------------------------
def spp_reference(x_nchw, conv_weight, conv_bias, num_levels=3,
                  pool_type='max_pool'):
    n, c, h, w = x_nchw.shape
    outs = []
    for i in range(num_levels):
        k = [1, 2, 4][i]
        xr = x_nchw.reshape(n, c, h // k, k, w // k, k)
        if pool_type == 'max_pool':
            pooled = jnp.max(xr, axis=(3, 5))
        else:
            pooled = jnp.mean(xr, axis=(3, 5))
        conv = jax.lax.conv_general_dilated(
            pooled, conv_weight, window_strides=(1, 1), padding='SAME',
            dimension_numbers=('NCHW', 'OIHW', 'NCHW'))
        conv = jax.nn.relu(conv + conv_bias.reshape(1, c, 1, 1))
        ah = _bilinear_matrix(h, h // k)
        aw = _bilinear_matrix(w, w // k)
        up = jnp.einsum('hi,ncij,wj->nchw', ah, conv, aw)
        outs.append(up)
    outs.append(x_nchw)
    return jnp.concatenate(outs, axis=1)


if __name__ == "__main__":
    N, C, H, W = 2, 4, 16, 16
    key = jax.random.PRNGKey(0)
    kx, kw, kb = jax.random.split(key, 3)

    x = jax.random.normal(kx, (N, C, H, W), dtype=jnp.float32)
    # Deterministic synthetic Conv2d(C, C, 3, padding=1) params.
    conv_weight = 0.1 * jax.random.normal(kw, (C, C, 3, 3), dtype=jnp.float32)
    conv_bias = 0.1 * jax.random.normal(kb, (C,), dtype=jnp.float32)

    # Tolerance note: the MXU operands (weights, patches, sel/upsample matrices)
    # are bf16 with f32 accumulation, giving ~1e-3..1e-2 abs deviation from the
    # f32 XLA reference; a real pooling/conv/upsample bug would be O(0.1..1).
    ATOL = RTOL = 2e-2

    out = spp_forward(x, conv_weight, conv_bias, num_levels=3,
                      pool_type='max_pool')
    out = jax.block_until_ready(out)
    assert out.shape == (N, 4 * C, H, W), out.shape
    ref = spp_reference(x, conv_weight, conv_bias, num_levels=3,
                        pool_type='max_pool')
    err = float(jnp.max(jnp.abs(out - ref)))
    assert jnp.allclose(out, ref, atol=ATOL, rtol=RTOL), f"max abs err {err}"

    out_a = spp_forward(x, conv_weight, conv_bias, num_levels=3,
                        pool_type='avg_pool')
    out_a = jax.block_until_ready(out_a)
    ref_a = spp_reference(x, conv_weight, conv_bias, num_levels=3,
                          pool_type='avg_pool')
    err_a = float(jnp.max(jnp.abs(out_a - ref_a)))
    assert jnp.allclose(out_a, ref_a, atol=ATOL, rtol=RTOL), f"max abs err {err_a}"

    print("KERNEL_OK")
</pallas_src>

<mosaic_0001>
module attributes {stable_mosaic.version = 11 : i64} {
  func.func @_spp_fused_kernel(%arg0: i32, %arg1: memref<2x4x256xf32, #tpu.memory_space<vmem>>, %arg2: memref<4x72xbf16, #tpu.memory_space<vmem>>, %arg3: memref<4x1xf32, #tpu.memory_space<vmem>>, %arg4: memref<9x512xf32, #tpu.memory_space<vmem>>, %arg5: memref<9x128xf32, #tpu.memory_space<vmem>>, %arg6: memref<512x128xbf16, #tpu.memory_space<vmem>>, %arg7: memref<128x512xbf16, #tpu.memory_space<vmem>>, %arg8: memref<9x32xf32, #tpu.memory_space<vmem>>, %arg9: memref<512x32xbf16, #tpu.memory_space<vmem>>, %arg10: memref<32x512xbf16, #tpu.memory_space<vmem>>, %arg11: memref<2x16x256xf32, #tpu.memory_space<vmem>>) attributes {dimension_semantics = [#tpu.dimension_semantics<parallel>], iteration_bounds = array<i64: 1>, scalar_prefetch = 0 : i64, scratch_operands = 0 : i64, tpu.core_type = #tpu.core_type<tc>, window_params = [{transform_indices = @transform_0, window_bounds = array<i64: 2, 4, 256>}, {pipeline_mode = #tpu.pipeline_mode<synchronous>, transform_indices = @transform_1, window_bounds = array<i64: 4, 72>}, {pipeline_mode = #tpu.pipeline_mode<synchronous>, transform_indices = @transform_2, window_bounds = array<i64: 4, 1>}, {pipeline_mode = #tpu.pipeline_mode<synchronous>, transform_indices = @transform_3, window_bounds = array<i64: 9, 512>}, {pipeline_mode = #tpu.pipeline_mode<synchronous>, transform_indices = @transform_4, window_bounds = array<i64: 9, 128>}, {pipeline_mode = #tpu.pipeline_mode<synchronous>, transform_indices = @transform_5, window_bounds = array<i64: 512, 128>}, {pipeline_mode = #tpu.pipeline_mode<synchronous>, transform_indices = @transform_6, window_bounds = array<i64: 128, 512>}, {pipeline_mode = #tpu.pipeline_mode<synchronous>, transform_indices = @transform_7, window_bounds = array<i64: 9, 32>}, {pipeline_mode = #tpu.pipeline_mode<synchronous>, transform_indices = @transform_8, window_bounds = array<i64: 512, 32>}, {pipeline_mode = #tpu.pipeline_mode<synchronous>, transform_indices = @transform_9, window_bounds = array<i64: 32, 512>}, {transform_indices = @transform_10, window_bounds = array<i64: 2, 16, 256>}]} {
    %c0 = arith.constant 0 : index
    %c0_0 = arith.constant 0 : index
    %c0_1 = arith.constant 0 : index
    %0 = vector.load %arg1[%c0, %c0_0, %c0_1] : memref<2x4x256xf32, #tpu.memory_space<vmem>>, vector<1x4x256xf32>
    %1 = vector.shape_cast %0 : vector<1x4x256xf32> to vector<4x256xf32>
    %c1 = arith.constant 1 : index
    %c0_2 = arith.constant 0 : index
    %c0_3 = arith.constant 0 : index
    %2 = vector.load %arg1[%c1, %c0_2, %c0_3] : memref<2x4x256xf32, #tpu.memory_space<vmem>>, vector<1x4x256xf32>
    %3 = vector.shape_cast %2 : vector<1x4x256xf32> to vector<4x256xf32>
    %4 = tpu.concatenate %1, %3 in 1 : vector<4x256xf32>, vector<4x256xf32> -> vector<4x512xf32>
    %cst = arith.constant 0.000000e+00 : f32
    %5 = vector.broadcast %cst : f32 to vector<4x512xf32>
    %6 = tpu.concatenate %4, %5 in 0 : vector<4x512xf32>, vector<4x512xf32> -> vector<8x512xf32>
    %c0_4 = arith.constant 0 : index
    %c0_5 = arith.constant 0 : index
    %7 = vector.load %arg4[%c0_4, %c0_5] : memref<9x512xf32, #tpu.memory_space<vmem>>, vector<9x512xf32>
    %c17_i32 = arith.constant 17 : i32
    %8 = tpu.dynamic_rotate %6 by %c17_i32 dim 1 : vector<8x512xf32>, i32 -> vector<8x512xf32>
    %9 = vector.extract_strided_slice %7 {offsets = [0, 0], sizes = [1, 512], strides = [1, 1]} : vector<9x512xf32> to vector<1x512xf32>
    %10 = vector.broadcast %9 : vector<1x512xf32> to vector<8x512xf32>
    %11 = arith.mulf %8, %10 : vector<8x512xf32>
    %c16_i32 = arith.constant 16 : i32
    %12 = tpu.dynamic_rotate %6 by %c16_i32 dim 1 : vector<8x512xf32>, i32 -> vector<8x512xf32>
    %13 = vector.extract_strided_slice %7 {offsets = [1, 0], sizes = [1, 512], strides = [1, 1]} : vector<9x512xf32> to vector<1x512xf32>
    %14 = vector.broadcast %13 : vector<1x512xf32> to vector<8x512xf32>
    %15 = arith.mulf %12, %14 : vector<8x512xf32>
    %c15_i32 = arith.constant 15 : i32
    %16 = tpu.dynamic_rotate %6 by %c15_i32 dim 1 : vector<8x512xf32>, i32 -> vector<8x512xf32>
    %17 = vector.extract_strided_slice %7 {offsets = [2, 0], sizes = [1, 512], strides = [1, 1]} : vector<9x512xf32> to vector<1x512xf32>
    %18 = vector.broadcast %17 : vector<1x512xf32> to vector<8x512xf32>
    %19 = arith.mulf %16, %18 : vector<8x512xf32>
    %c1_i32 = arith.constant 1 : i32
    %20 = tpu.dynamic_rotate %6 by %c1_i32 dim 1 : vector<8x512xf32>, i32 -> vector<8x512xf32>
    %21 = vector.extract_strided_slice %7 {offsets = [3, 0], sizes = [1, 512], strides = [1, 1]} : vector<9x512xf32> to vector<1x512xf32>
    %22 = vector.broadcast %21 : vector<1x512xf32> to vector<8x512xf32>
    %23 = arith.mulf %20, %22 : vector<8x512xf32>
    %c511_i32 = arith.constant 511 : i32
    %24 = tpu.dynamic_rotate %6 by %c511_i32 dim 1 : vector<8x512xf32>, i32 -> vector<8x512xf32>
    %25 = vector.extract_strided_slice %7 {offsets = [5, 0], sizes = [1, 512], strides = [1, 1]} : vector<9x512xf32> to vector<1x512xf32>
    %26 = vector.broadcast %25 : vector<1x512xf32> to vector<8x512xf32>
    %27 = arith.mulf %24, %26 : vector<8x512xf32>
    %c497_i32 = arith.constant 497 : i32
    %28 = tpu.dynamic_rotate %6 by %c497_i32 dim 1 : vector<8x512xf32>, i32 -> vector<8x512xf32>
    %29 = vector.extract_strided_slice %7 {offsets = [6, 0], sizes = [1, 512], strides = [1, 1]} : vector<9x512xf32> to vector<1x512xf32>
    %30 = vector.broadcast %29 : vector<1x512xf32> to vector<8x512xf32>
    %31 = arith.mulf %28, %30 : vector<8x512xf32>
    %c496_i32 = arith.constant 496 : i32
    %32 = tpu.dynamic_rotate %6 by %c496_i32 dim 1 : vector<8x512xf32>, i32 -> vector<8x512xf32>
    %33 = vector.extract_strided_slice %7 {offsets = [7, 0], sizes = [1, 512], strides = [1, 1]} : vector<9x512xf32> to vector<1x512xf32>
    %34 = vector.broadcast %33 : vector<1x512xf32> to vector<8x512xf32>
    %35 = arith.mulf %32, %34 : vector<8x512xf32>
    %c495_i32 = arith.constant 495 : i32
    %36 = tpu.dynamic_rotate %6 by %c495_i32 dim 1 : vector<8x512xf32>, i32 -> vector<8x512xf32>
    %37 = vector.extract_strided_slice %7 {offsets = [8, 0], sizes = [1, 512], strides = [1, 1]} : vector<9x512xf32> to vector<1x512xf32>
    %38 = vector.broadcast %37 : vector<1x512xf32> to vector<8x512xf32>
    %39 = arith.mulf %36, %38 : vector<8x512xf32>
    %40 = tpu.concatenate %11, %15, %19, %23, %6, %27, %31, %35, %39 in 0 : vector<8x512xf32>, vector<8x512xf32>, vector<8x512xf32>, vector<8x512xf32>, vector<8x512xf32>, vector<8x512xf32>, vector<8x512xf32>, vector<8x512xf32>, vector<8x512xf32> -> vector<72x512xf32>
    %c511_i32_6 = arith.constant 511 : i32
    %41 = tpu.dynamic_rotate %6 by %c511_i32_6 dim 1 : vector<8x512xf32>, i32 -> vector<8x512xf32>
    %42 = arith.maximumf %6, %41 : vector<8x512xf32>
    %c496_i32_7 = arith.constant 496 : i32
    %43 = tpu.dynamic_rotate %42 by %c496_i32_7 dim 1 : vector<8x512xf32>, i32 -> vector<8x512xf32>
    %44 = arith.maximumf %42, %43 : vector<8x512xf32>
    %45 = arith.truncf %44 : vector<8x512xf32> to vector<8x512xbf16>
    %c0_8 = arith.constant 0 : index
    %c0_9 = arith.constant 0 : index
    %46 = vector.load %arg6[%c0_8, %c0_9] : memref<512x128xbf16, #tpu.memory_space<vmem>>, vector<512x128xbf16>
    %cst_10 = arith.constant dense<0.000000e+00> : vector<8x128xf32>
    %47 = tpu.matmul %45, %46, %cst_10 {dimension_numbers = #tpu.dot_dimension_numbers<[1], [0], [0], [1], [0, 0, 1, 1], [], []>} : vector<8x512xbf16>, vector<512x128xbf16>, vector<8x128xf32> -> vector<8x128xf32>
    %c0_11 = arith.constant 0 : index
    %c0_12 = arith.constant 0 : index
    %48 = vector.load %arg5[%c0_11, %c0_12] : memref<9x128xf32, #tpu.memory_space<vmem>>, vector<9x128xf32>
    %c9_i32 = arith.constant 9 : i32
    %49 = tpu.dynamic_rotate %47 by %c9_i32 dim 1 : vector<8x128xf32>, i32 -> vector<8x128xf32>
    %50 = vector.extract_strided_slice %48 {offsets = [0, 0], sizes = [1, 128], strides = [1, 1]} : vector<9x128xf32> to vector<1x128xf32>
    %51 = vector.broadcast %50 : vector<1x128xf32> to vector<8x128xf32>
    %52 = arith.mulf %49, %51 : vector<8x128xf32>
    %c8_i32 = arith.constant 8 : i32
    %53 = tpu.dynamic_rotate %47 by %c8_i32 dim 1 : vector<8x128xf32>, i32 -> vector<8x128xf32>
    %54 = vector.extract_strided_slice %48 {offsets = [1, 0], sizes = [1, 128], strides = [1, 1]} : vector<9x128xf32> to vector<1x128xf32>
    %55 = vector.broadcast %54 : vector<1x128xf32> to vector<8x128xf32>
    %56 = arith.mulf %53, %55 : vector<8x128xf32>
    %c7_i32 = arith.constant 7 : i32
    %57 = tpu.dynamic_rotate %47 by %c7_i32 dim 1 : vector<8x128xf32>, i32 -> vector<8x128xf32>
    %58 = vector.extract_strided_slice %48 {offsets = [2, 0], sizes = [1, 128], strides = [1, 1]} : vector<9x128xf32> to vector<1x128xf32>
    %59 = vector.broadcast %58 : vector<1x128xf32> to vector<8x128xf32>
    %60 = arith.mulf %57, %59 : vector<8x128xf32>
    %c1_i32_13 = arith.constant 1 : i32
    %61 = tpu.dynamic_rotate %47 by %c1_i32_13 dim 1 : vector<8x128xf32>, i32 -> vector<8x128xf32>
    %62 = vector.extract_strided_slice %48 {offsets = [3, 0], sizes = [1, 128], strides = [1, 1]} : vector<9x128xf32> to vector<1x128xf32>
    %63 = vector.broadcast %62 : vector<1x128xf32> to vector<8x128xf32>
    %64 = arith.mulf %61, %63 : vector<8x128xf32>
    %c127_i32 = arith.constant 127 : i32
    %65 = tpu.dynamic_rotate %47 by %c127_i32 dim 1 : vector<8x128xf32>, i32 -> vector<8x128xf32>
    %66 = vector.extract_strided_slice %48 {offsets = [5, 0], sizes = [1, 128], strides = [1, 1]} : vector<9x128xf32> to vector<1x128xf32>
    %67 = vector.broadcast %66 : vector<1x128xf32> to vector<8x128xf32>
    %68 = arith.mulf %65, %67 : vector<8x128xf32>
    %c121_i32 = arith.constant 121 : i32
    %69 = tpu.dynamic_rotate %47 by %c121_i32 dim 1 : vector<8x128xf32>, i32 -> vector<8x128xf32>
    %70 = vector.extract_strided_slice %48 {offsets = [6, 0], sizes = [1, 128], strides = [1, 1]} : vector<9x128xf32> to vector<1x128xf32>
    %71 = vector.broadcast %70 : vector<1x128xf32> to vector<8x128xf32>
    %72 = arith.mulf %69, %71 : vector<8x128xf32>
    %c120_i32 = arith.constant 120 : i32
    %73 = tpu.dynamic_rotate %47 by %c120_i32 dim 1 : vector<8x128xf32>, i32 -> vector<8x128xf32>
    %74 = vector.extract_strided_slice %48 {offsets = [7, 0], sizes = [1, 128], strides = [1, 1]} : vector<9x128xf32> to vector<1x128xf32>
    %75 = vector.broadcast %74 : vector<1x128xf32> to vector<8x128xf32>
    %76 = arith.mulf %73, %75 : vector<8x128xf32>
    %c119_i32 = arith.constant 119 : i32
    %77 = tpu.dynamic_rotate %47 by %c119_i32 dim 1 : vector<8x128xf32>, i32 -> vector<8x128xf32>
    %78 = vector.extract_strided_slice %48 {offsets = [8, 0], sizes = [1, 128], strides = [1, 1]} : vector<9x128xf32> to vector<1x128xf32>
    %79 = vector.broadcast %78 : vector<1x128xf32> to vector<8x128xf32>
    %80 = arith.mulf %77, %79 : vector<8x128xf32>
    %81 = tpu.concatenate %52, %56, %60, %64, %47, %68, %72, %76, %80 in 0 : vector<8x128xf32>, vector<8x128xf32>, vector<8x128xf32>, vector<8x128xf32>, vector<8x128xf32>, vector<8x128xf32>, vector<8x128xf32>, vector<8x128xf32>, vector<8x128xf32> -> vector<72x128xf32>
    %c511_i32_14 = arith.constant 511 : i32
    %82 = tpu.dynamic_rotate %6 by %c511_i32_14 dim 1 : vector<8x512xf32>, i32 -> vector<8x512xf32>
    %83 = arith.maximumf %6, %82 : vector<8x512xf32>
    %c510_i32 = arith.constant 510 : i32
    %84 = tpu.dynamic_rotate %6 by %c510_i32 dim 1 : vector<8x512xf32>, i32 -> vector<8x512xf32>
    %85 = arith.maximumf %83, %84 : vector<8x512xf32>
    %c509_i32 = arith.constant 509 : i32
    %86 = tpu.dynamic_rotate %6 by %c509_i32 dim 1 : vector<8x512xf32>, i32 -> vector<8x512xf32>
    %87 = arith.maximumf %85, %86 : vector<8x512xf32>
    %c496_i32_15 = arith.constant 496 : i32
    %88 = tpu.dynamic_rotate %87 by %c496_i32_15 dim 1 : vector<8x512xf32>, i32 -> vector<8x512xf32>
    %89 = arith.maximumf %87, %88 : vector<8x512xf32>
    %c480_i32 = arith.constant 480 : i32
    %90 = tpu.dynamic_rotate %87 by %c480_i32 dim 1 : vector<8x512xf32>, i32 -> vector<8x512xf32>
    %91 = arith.maximumf %89, %90 : vector<8x512xf32>
    %c464_i32 = arith.constant 464 : i32
    %92 = tpu.dynamic_rotate %87 by %c464_i32 dim 1 : vector<8x512xf32>, i32 -> vector<8x512xf32>
    %93 = arith.maximumf %91, %92 : vector<8x512xf32>
    %94 = arith.truncf %93 : vector<8x512xf32> to vector<8x512xbf16>
    %c0_16 = arith.constant 0 : index
    %c0_17 = arith.constant 0 : index
    %95 = vector.load %arg9[%c0_16, %c0_17] : memref<512x32xbf16, #tpu.memory_space<vmem>>, vector<512x32xbf16>
    %cst_18 = arith.constant dense<0.000000e+00> : vector<8x32xf32>
    %96 = tpu.matmul %94, %95, %cst_18 {dimension_numbers = #tpu.dot_dimension_numbers<[1], [0], [0], [1], [0, 0, 1, 1], [], []>} : vector<8x512xbf16>, vector<512x32xbf16>, vector<8x32xf32> -> vector<8x32xf32>
    %c0_19 = arith.constant 0 : index
    %c0_20 = arith.constant 0 : index
    %97 = vector.load %arg8[%c0_19, %c0_20] : memref<9x32xf32, #tpu.memory_space<vmem>>, vector<9x32xf32>
    %cst_21 = arith.constant 0.000000e+00 : f32
    %98 = vector.broadcast %cst_21 : f32 to vector<8x5xf32>
    %99 = vector.extract_strided_slice %96 {offsets = [0, 0], sizes = [8, 27], strides = [1, 1]} : vector<8x32xf32> to vector<8x27xf32>
    %100 = tpu.concatenate %98, %99 in 1 : vector<8x5xf32>, vector<8x27xf32> -> vector<8x32xf32>
    %101 = vector.extract_strided_slice %97 {offsets = [0, 0], sizes = [1, 32], strides = [1, 1]} : vector<9x32xf32> to vector<1x32xf32>
    %102 = vector.broadcast %101 : vector<1x32xf32> to vector<8x32xf32>
    %103 = arith.mulf %100, %102 : vector<8x32xf32>
    %cst_22 = arith.constant 0.000000e+00 : f32
    %104 = vector.broadcast %cst_22 : f32 to vector<8x4xf32>
    %105 = vector.extract_strided_slice %96 {offsets = [0, 0], sizes = [8, 28], strides = [1, 1]} : vector<8x32xf32> to vector<8x28xf32>
    %106 = tpu.concatenate %104, %105 in 1 : vector<8x4xf32>, vector<8x28xf32> -> vector<8x32xf32>
    %107 = vector.extract_strided_slice %97 {offsets = [1, 0], sizes = [1, 32], strides = [1, 1]} : vector<9x32xf32> to vector<1x32xf32>
    %108 = vector.broadcast %107 : vector<1x32xf32> to vector<8x32xf32>
    %109 = arith.mulf %106, %108 : vector<8x32xf32>
    %cst_23 = arith.constant 0.000000e+00 : f32
    %110 = vector.broadcast %cst_23 : f32 to vector<8x3xf32>
    %111 = vector.extract_strided_slice %96 {offsets = [0, 0], sizes = [8, 29], strides = [1, 1]} : vector<8x32xf32> to vector<8x29xf32>
    %112 = tpu.concatenate %110, %111 in 1 : vector<8x3xf32>, vector<8x29xf32> -> vector<8x32xf32>
    %113 = vector.extract_strided_slice %97 {offsets = [2, 0], sizes = [1, 32], strides = [1, 1]} : vector<9x32xf32> to vector<1x32xf32>
    %114 = vector.broadcast %113 : vector<1x32xf32> to vector<8x32xf32>
    %115 = arith.mulf %112, %114 : vector<8x32xf32>
    %cst_24 = arith.constant 0.000000e+00 : f32
    %116 = vector.broadcast %cst_24 : f32 to vector<8x1xf32>
    %117 = vector.extract_strided_slice %96 {offsets = [0, 0], sizes = [8, 31], strides = [1, 1]} : vector<8x32xf32> to vector<8x31xf32>
    %118 = tpu.concatenate %116, %117 in 1 : vector<8x1xf32>, vector<8x31xf32> -> vector<8x32xf32>
    %119 = vector.extract_strided_slice %97 {offsets = [3, 0], sizes = [1, 32], strides = [1, 1]} : vector<9x32xf32> to vector<1x32xf32>
    %120 = vector.broadcast %119 : vector<1x32xf32> to vector<8x32xf32>
    %121 = arith.mulf %118, %120 : vector<8x32xf32>
    %cst_25 = arith.constant 0.000000e+00 : f32
    %122 = vector.broadcast %cst_25 : f32 to vector<8x1xf32>
    %123 = vector.extract_strided_slice %96 {offsets = [0, 1], sizes = [8, 31], strides = [1, 1]} : vector<8x32xf32> to vector<8x31xf32>
    %124 = tpu.concatenate %123, %122 in 1 : vector<8x31xf32>, vector<8x1xf32> -> vector<8x32xf32>
    %125 = vector.extract_strided_slice %97 {offsets = [5, 0], sizes = [1, 32], strides = [1, 1]} : vector<9x32xf32> to vector<1x32xf32>
    %126 = vector.broadcast %125 : vector<1x32xf32> to vector<8x32xf32>
    %127 = arith.mulf %124, %126 : vector<8x32xf32>
    %cst_26 = arith.constant 0.000000e+00 : f32
    %128 = vector.broadcast %cst_26 : f32 to vector<8x3xf32>
    %129 = vector.extract_strided_slice %96 {offsets = [0, 3], sizes = [8, 29], strides = [1, 1]} : vector<8x32xf32> to vector<8x29xf32>
    %130 = tpu.concatenate %129, %128 in 1 : vector<8x29xf32>, vector<8x3xf32> -> vector<8x32xf32>
    %131 = vector.extract_strided_slice %97 {offsets = [6, 0], sizes = [1, 32], strides = [1, 1]} : vector<9x32xf32> to vector<1x32xf32>
    %132 = vector.broadcast %131 : vector<1x32xf32> to vector<8x32xf32>
    %133 = arith.mulf %130, %132 : vector<8x32xf32>
    %cst_27 = arith.constant 0.000000e+00 : f32
    %134 = vector.broadcast %cst_27 : f32 to vector<8x4xf32>
    %135 = vector.extract_strided_slice %96 {offsets = [0, 4], sizes = [8, 28], strides = [1, 1]} : vector<8x32xf32> to vector<8x28xf32>
    %136 = tpu.concatenate %135, %134 in 1 : vector<8x28xf32>, vector<8x4xf32> -> vector<8x32xf32>
    %137 = vector.extract_strided_slice %97 {offsets = [7, 0], sizes = [1, 32], strides = [1, 1]} : vector<9x32xf32> to vector<1x32xf32>
    %138 = vector.broadcast %137 : vector<1x32xf32> to vector<8x32xf32>
    %139 = arith.mulf %136, %138 : vector<8x32xf32>
    %cst_28 = arith.constant 0.000000e+00 : f32
    %140 = vector.broadcast %cst_28 : f32 to vector<8x5xf32>
    %141 = vector.extract_strided_slice %96 {offsets = [0, 5], sizes = [8, 27], strides = [1, 1]} : vector<8x32xf32> to vector<8x27xf32>
    %142 = tpu.concatenate %141, %140 in 1 : vector<8x27xf32>, vector<8x5xf32> -> vector<8x32xf32>
    %143 = vector.extract_strided_slice %97 {offsets = [8, 0], sizes = [1, 32], strides = [1, 1]} : vector<9x32xf32> to vector<1x32xf32>
    %144 = vector.broadcast %143 : vector<1x32xf32> to vector<8x32xf32>
    %145 = arith.mulf %142, %144 : vector<8x32xf32>
    %146 = tpu.concatenate %103, %109, %115, %121, %96, %127, %133, %139, %145 in 0 : vector<8x32xf32>, vector<8x32xf32>, vector<8x32xf32>, vector<8x32xf32>, vector<8x32xf32>, vector<8x32xf32>, vector<8x32xf32>, vector<8x32xf32>, vector<8x32xf32> -> vector<72x32xf32>
    %147 = tpu.concatenate %40, %81, %146 in 1 : vector<72x512xf32>, vector<72x128xf32>, vector<72x32xf32> -> vector<72x672xf32>
    %148 = arith.truncf %147 : vector<72x672xf32> to vector<72x672xbf16>
    %c0_29 = arith.constant 0 : index
    %c0_30 = arith.constant 0 : index
    %149 = vector.load %arg2[%c0_29, %c0_30] : memref<4x72xbf16, #tpu.memory_space<vmem>>, vector<4x72xbf16>
    %cst_31 = arith.constant dense<0.000000e+00> : vector<4x672xf32>
    %150 = tpu.matmul %149, %148, %cst_31 {dimension_numbers = #tpu.dot_dimension_numbers<[1], [0], [0], [1], [0, 0, 1, 1], [], []>} : vector<4x72xbf16>, vector<72x672xbf16>, vector<4x672xf32> -> vector<4x672xf32>
    %c0_32 = arith.constant 0 : index
    %c0_33 = arith.constant 0 : index
    %151 = vector.load %arg3[%c0_32, %c0_33] : memref<4x1xf32, #tpu.memory_space<vmem>>, vector<4x1xf32>
    %152 = vector.broadcast %151 : vector<4x1xf32> to vector<4x672xf32>
    %153 = arith.addf %150, %152 : vector<4x672xf32>
    %cst_34 = arith.constant 0.000000e+00 : f32
    %154 = vector.broadcast %cst_34 : f32 to vector<4x672xf32>
    %155 = arith.maximumf %153, %154 : vector<4x672xf32>
    %156 = vector.extract_strided_slice %155 {offsets = [0, 0], sizes = [4, 512], strides = [1, 1]} : vector<4x672xf32> to vector<4x512xf32>
    %157 = vector.extract_strided_slice %156 {offsets = [0, 0], sizes = [4, 256], strides = [1, 1]} : vector<4x512xf32> to vector<4x256xf32>
    %c0_35 = arith.constant 0 : index
    %c0_36 = arith.constant 0 : index
    %c0_37 = arith.constant 0 : index
    %158 = vector.load %arg11[%c0_35, %c0_36, %c0_37] : memref<2x16x256xf32, #tpu.memory_space<vmem>>, vector<1x4x256xf32>
    %159 = vector.shape_cast %158 : vector<1x4x256xf32> to vector<4x256xf32>
    %160 = vector.shape_cast %157 : vector<4x256xf32> to vector<1x4x256xf32>
    tpu.vector_store %arg11[%c0_35, %c0_36, %c0_37], %160 {strides = array<i32>} : memref<2x16x256xf32, #tpu.memory_space<vmem>>, vector<1x4x256xf32>,
    %161 = vector.extract_strided_slice %156 {offsets = [0, 256], sizes = [4, 256], strides = [1, 1]} : vector<4x512xf32> to vector<4x256xf32>
    %c1_38 = arith.constant 1 : index
    %c0_39 = arith.constant 0 : index
    %c0_40 = arith.constant 0 : index
    %162 = vector.load %arg11[%c1_38, %c0_39, %c0_40] : memref<2x16x256xf32, #tpu.memory_space<vmem>>, vector<1x4x256xf32>
    %163 = vector.shape_cast %162 : vector<1x4x256xf32> to vector<4x256xf32>
    %164 = vector.shape_cast %161 : vector<4x256xf32> to vector<1x4x256xf32>
    tpu.vector_store %arg11[%c1_38, %c0_39, %c0_40], %164 {strides = array<i32>} : memref<2x16x256xf32, #tpu.memory_space<vmem>>, vector<1x4x256xf32>,
    %165 = vector.extract_strided_slice %155 {offsets = [0, 512], sizes = [4, 128], strides = [1, 1]} : vector<4x672xf32> to vector<4x128xf32>
    %166 = arith.truncf %165 : vector<4x128xf32> to vector<4x128xbf16>
    %c0_41 = arith.constant 0 : index
    %c0_42 = arith.constant 0 : index
    %167 = vector.load %arg7[%c0_41, %c0_42] : memref<128x512xbf16, #tpu.memory_space<vmem>>, vector<128x512xbf16>
    %cst_43 = arith.constant dense<0.000000e+00> : vector<4x512xf32>
    %168 = tpu.matmul %166, %167, %cst_43 {dimension_numbers = #tpu.dot_dimension_numbers<[1], [0], [0], [1], [0, 0, 1, 1], [], []>} : vector<4x128xbf16>, vector<128x512xbf16>, vector<4x512xf32> -> vector<4x512xf32>
    %169 = vector.extract_strided_slice %168 {offsets = [0, 0], sizes = [4, 256], strides = [1, 1]} : vector<4x512xf32> to vector<4x256xf32>
    %c0_44 = arith.constant 0 : index
    %c4 = arith.constant 4 : index
    %c0_45 = arith.constant 0 : index
    %170 = vector.load %arg11[%c0_44, %c4, %c0_45] : memref<2x16x256xf32, #tpu.memory_space<vmem>>, vector<1x4x256xf32>
    %171 = vector.shape_cast %170 : vector<1x4x256xf32> to vector<4x256xf32>
    %172 = vector.shape_cast %169 : vector<4x256xf32> to vector<1x4x256xf32>
    tpu.vector_store %arg11[%c0_44, %c4, %c0_45], %172 {strides = array<i32>} : memref<2x16x256xf32, #tpu.memory_space<vmem>>, vector<1x4x256xf32>,
    %173 = vector.extract_strided_slice %168 {offsets = [0, 256], sizes = [4, 256], strides = [1, 1]} : vector<4x512xf32> to vector<4x256xf32>
    %c1_46 = arith.constant 1 : index
    %c4_47 = arith.constant 4 : index
    %c0_48 = arith.constant 0 : index
    %174 = vector.load %arg11[%c1_46, %c4_47, %c0_48] : memref<2x16x256xf32, #tpu.memory_space<vmem>>, vector<1x4x256xf32>
    %175 = vector.shape_cast %174 : vector<1x4x256xf32> to vector<4x256xf32>
    %176 = vector.shape_cast %173 : vector<4x256xf32> to vector<1x4x256xf32>
    tpu.vector_store %arg11[%c1_46, %c4_47, %c0_48], %176 {strides = array<i32>} : memref<2x16x256xf32, #tpu.memory_space<vmem>>, vector<1x4x256xf32>,
    %177 = vector.extract_strided_slice %155 {offsets = [0, 640], sizes = [4, 32], strides = [1, 1]} : vector<4x672xf32> to vector<4x32xf32>
    %178 = arith.truncf %177 : vector<4x32xf32> to vector<4x32xbf16>
    %c0_49 = arith.constant 0 : index
    %c0_50 = arith.constant 0 : index
    %179 = vector.load %arg10[%c0_49, %c0_50] : memref<32x512xbf16, #tpu.memory_space<vmem>>, vector<32x512xbf16>
    %cst_51 = arith.constant dense<0.000000e+00> : vector<4x512xf32>
    %180 = tpu.matmul %178, %179, %cst_51 {dimension_numbers = #tpu.dot_dimension_numbers<[1], [0], [0], [1], [0, 0, 1, 1], [], []>} : vector<4x32xbf16>, vector<32x512xbf16>, vector<4x512xf32> -> vector<4x512xf32>
    %181 = vector.extract_strided_slice %180 {offsets = [0, 0], sizes = [4, 256], strides = [1, 1]} : vector<4x512xf32> to vector<4x256xf32>
    %c0_52 = arith.constant 0 : index
    %c8 = arith.constant 8 : index
    %c0_53 = arith.constant 0 : index
    %182 = vector.load %arg11[%c0_52, %c8, %c0_53] : memref<2x16x256xf32, #tpu.memory_space<vmem>>, vector<1x4x256xf32>
    %183 = vector.shape_cast %182 : vector<1x4x256xf32> to vector<4x256xf32>
    %184 = vector.shape_cast %181 : vector<4x256xf32> to vector<1x4x256xf32>
    tpu.vector_store %arg11[%c0_52, %c8, %c0_53], %184 {strides = array<i32>} : memref<2x16x256xf32, #tpu.memory_space<vmem>>, vector<1x4x256xf32>,
    %185 = vector.extract_strided_slice %180 {offsets = [0, 256], sizes = [4, 256], strides = [1, 1]} : vector<4x512xf32> to vector<4x256xf32>
    %c1_54 = arith.constant 1 : index
    %c8_55 = arith.constant 8 : index
    %c0_56 = arith.constant 0 : index
    %186 = vector.load %arg11[%c1_54, %c8_55, %c0_56] : memref<2x16x256xf32, #tpu.memory_space<vmem>>, vector<1x4x256xf32>
    %187 = vector.shape_cast %186 : vector<1x4x256xf32> to vector<4x256xf32>
    %188 = vector.shape_cast %185 : vector<4x256xf32> to vector<1x4x256xf32>
    tpu.vector_store %arg11[%c1_54, %c8_55, %c0_56], %188 {strides = array<i32>} : memref<2x16x256xf32, #tpu.memory_space<vmem>>, vector<1x4x256xf32>,
    %c0_57 = arith.constant 0 : index
    %c0_58 = arith.constant 0 : index
    %c0_59 = arith.constant 0 : index
    %189 = vector.load %arg1[%c0_57, %c0_58, %c0_59] : memref<2x4x256xf32, #tpu.memory_space<vmem>>, vector<1x4x256xf32>
    %190 = vector.shape_cast %189 : vector<1x4x256xf32> to vector<4x256xf32>
    %c0_60 = arith.constant 0 : index
    %c12 = arith.constant 12 : index
    %c0_61 = arith.constant 0 : index
    %191 = vector.load %arg11[%c0_60, %c12, %c0_61] : memref<2x16x256xf32, #tpu.memory_space<vmem>>, vector<1x4x256xf32>
    %192 = vector.shape_cast %191 : vector<1x4x256xf32> to vector<4x256xf32>
    %193 = vector.shape_cast %190 : vector<4x256xf32> to vector<1x4x256xf32>
    tpu.vector_store %arg11[%c0_60, %c12, %c0_61], %193 {strides = array<i32>} : memref<2x16x256xf32, #tpu.memory_space<vmem>>, vector<1x4x256xf32>,
    %c1_62 = arith.constant 1 : index
    %c0_63 = arith.constant 0 : index
    %c0_64 = arith.constant 0 : index
    %194 = vector.load %arg1[%c1_62, %c0_63, %c0_64] : memref<2x4x256xf32, #tpu.memory_space<vmem>>, vector<1x4x256xf32>
    %195 = vector.shape_cast %194 : vector<1x4x256xf32> to vector<4x256xf32>
    %c1_65 = arith.constant 1 : index
    %c12_66 = arith.constant 12 : index
    %c0_67 = arith.constant 0 : index
    %196 = vector.load %arg11[%c1_65, %c12_66, %c0_67] : memref<2x16x256xf32, #tpu.memory_space<vmem>>, vector<1x4x256xf32>
    %197 = vector.shape_cast %196 : vector<1x4x256xf32> to vector<4x256xf32>
    %198 = vector.shape_cast %195 : vector<4x256xf32> to vector<1x4x256xf32>
    tpu.vector_store %arg11[%c1_65, %c12_66, %c0_67], %198 {strides = array<i32>} : memref<2x16x256xf32, #tpu.memory_space<vmem>>, vector<1x4x256xf32>,
    return
  }
  func.func @transform_0(%arg0: i32) -> (i32, i32, i32) {
    %c0_i32 = arith.constant 0 : i32
    %c0_i32_0 = arith.constant 0 : i32
    %c0_i32_1 = arith.constant 0 : i32
    return %arg0, %c0_i32, %c0_i32_0 : i32, i32, i32
  }
  func.func @transform_1(%arg0: i32) -> (i32, i32) {
    %c0_i32 = arith.constant 0 : i32
    %c0_i32_0 = arith.constant 0 : i32
    %c0_i32_1 = arith.constant 0 : i32
    return %c0_i32, %c0_i32_0 : i32, i32
  }
  func.func @transform_2(%arg0: i32) -> (i32, i32) {
    %c0_i32 = arith.constant 0 : i32
    %c0_i32_0 = arith.constant 0 : i32
    %c0_i32_1 = arith.constant 0 : i32
    return %c0_i32, %c0_i32_0 : i32, i32
  }
  func.func @transform_3(%arg0: i32) -> (i32, i32) {
    %c0_i32 = arith.constant 0 : i32
    %c0_i32_0 = arith.constant 0 : i32
    %c0_i32_1 = arith.constant 0 : i32
    return %c0_i32, %c0_i32_0 : i32, i32
  }
  func.func @transform_4(%arg0: i32) -> (i32, i32) {
    %c0_i32 = arith.constant 0 : i32
    %c0_i32_0 = arith.constant 0 : i32
    %c0_i32_1 = arith.constant 0 : i32
    return %c0_i32, %c0_i32_0 : i32, i32
  }
  func.func @transform_5(%arg0: i32) -> (i32, i32) {
    %c0_i32 = arith.constant 0 : i32
    %c0_i32_0 = arith.constant 0 : i32
    %c0_i32_1 = arith.constant 0 : i32
    return %c0_i32, %c0_i32_0 : i32, i32
  }
  func.func @transform_6(%arg0: i32) -> (i32, i32) {
    %c0_i32 = arith.constant 0 : i32
    %c0_i32_0 = arith.constant 0 : i32
    %c0_i32_1 = arith.constant 0 : i32
    return %c0_i32, %c0_i32_0 : i32, i32
  }
  func.func @transform_7(%arg0: i32) -> (i32, i32) {
    %c0_i32 = arith.constant 0 : i32
    %c0_i32_0 = arith.constant 0 : i32
    %c0_i32_1 = arith.constant 0 : i32
    return %c0_i32, %c0_i32_0 : i32, i32
  }
  func.func @transform_8(%arg0: i32) -> (i32, i32) {
    %c0_i32 = arith.constant 0 : i32
    %c0_i32_0 = arith.constant 0 : i32
    %c0_i32_1 = arith.constant 0 : i32
    return %c0_i32, %c0_i32_0 : i32, i32
  }
  func.func @transform_9(%arg0: i32) -> (i32, i32) {
    %c0_i32 = arith.constant 0 : i32
    %c0_i32_0 = arith.constant 0 : i32
    %c0_i32_1 = arith.constant 0 : i32
    return %c0_i32, %c0_i32_0 : i32, i32
  }
  func.func @transform_10(%arg0: i32) -> (i32, i32, i32) {
    %c0_i32 = arith.constant 0 : i32
    %c0_i32_0 = arith.constant 0 : i32
    %c0_i32_1 = arith.constant 0 : i32
    return %arg0, %c0_i32, %c0_i32_0 : i32, i32, i32
  }
}

</mosaic_0001>

<bundles_post_ra>
// kernel: tpu_custom_call.1
= control target key start
LH: loop header
LB: loop body
LE: loop exit
PB: predicated region body
PF: predicated region fallthrough
CT: control target
= control target key end

     0   :  { %15 = vsyncpa [#allocation3], 0  ;;  %s3434_s0 = inlined_call_operand.hbm [shape: f32[2,4,256], index: 0, kind: input, shape index: {}]   ;;  %s3435_s1 = inlined_call_operand.vmem [shape: bf16[4,72], index: 1, kind: input, shape index: {}]   ;;  %s3436_s2 = inlined_call_operand.vmem [shape: f32[4,1], index: 2, kind: input, shape index: {}]   ;;  %s3437_s3 = inlined_call_operand.vmem [shape: f32[9,512], index: 3, kind: input, shape index: {}]   ;;  %s3438_s4 = inlined_call_operand.hbm [shape: f32[9,128], index: 4, kind: input, shape index: {}]   ;;  %s3439_s5 = inlined_call_operand.vmem [shape: bf16[512,128], index: 5, kind: input, shape index: {}]   ;;  %s3440_s6 = inlined_call_operand.hbm [shape: bf16[128,512], index: 6, kind: input, shape index: {}]   ;;  %s3441_s7 = inlined_call_operand.hbm [shape: f32[9,32], index: 7, kind: input, shape index: {}]   ;;  %s3442_s8 = inlined_call_operand.vmem [shape: bf16[512,32], index: 8, kind: input, shape index: {}]   ;;  %s3443_s9 = inlined_call_operand.hbm [shape: bf16[32,512], index: 9, kind: input, shape index: {}]   ;;  %s3444_s10 = inlined_call_operand.hbm [shape: f32[2,16,256], index: 10, kind: output, shape index: {}]  }
   0x1   :  { %16 = vsyncpa [#allocation6], 0 }
   0x2   :  { %17 = vsyncpa [#allocation9], 0 }
   0x3   :  { %18 = vsyncpa [#allocation4], 0  ;;  %s2542_s13 = smov [#allocation5]   ;;  %s2543_s15 = smov [#allocation8]  }
   0x4   :  { %s42_s14 = sshll.u32 %s2542_s13, 4  ;;  %s68_s16 = sshll.u32 %s2543_s15, 4  ;;  %s43_s14 = int_to_ptr.vmem [resolvable:$true] %s42_s14  ;;  %s69_s16 = int_to_ptr.vmem [resolvable:$true] %s68_s16 }
   0x5   :  { %s2422_s17 = scalar_lea.vmem %s43_s14, 256  ;;  %p2427_p1 = scmp.lt.s32.totalorder %s43_s14, %s43_s14 }
   0x6   :  { %p2423_p0 = scmp.ne.s32.totalorder %s43_s14, %s2422_s17  ;;  %p2428_p2 = scmp.lt.s32.totalorder %s2422_s17, %s2422_s17 }
   0x8   :  { %p2429_p3 = por %p2428_p2, %p2427_p1 }
   0xa   :  { %p2430_p4 = pnand %p2429_p3, %p2423_p0 }
   0xc   :  { %2433 = shalt.err (!%p2430_p4)
}
   0xd   :  { %s2544_s18 = smov 128   ;;  %s2545_s19 = smov 8  }
   0xe   :  { %48 = dma.hbm_to_vmem [thread:$0]  %s3438_s4, 256, %s43_s14, [#allocation6], %s2544_s18, %s2544_s18, %s2545_s19  }
   0xf   :  { %s2442_s22 = scalar_lea.vmem %s69_s16, 256  ;;  %p2447_p6 = scmp.lt.s32.totalorder %s69_s16, %s69_s16 }
  0x10   :  { %p2443_p5 = scmp.ne.s32.totalorder %s69_s16, %s2442_s22  ;;  %p2448_p7 = scmp.lt.s32.totalorder %s2442_s22, %s2442_s22 }
  0x12   :  { %p2449_p8 = por %p2448_p7, %p2447_p6 }
  0x14   :  { %p2450_p9 = pnand %p2449_p8, %p2443_p5 }
  0x16   :  { %2453 = shalt.err (!%p2450_p9)
}
  0x17   :  { %74 = dma.hbm_to_vmem [thread:$0]  %s3441_s7, 256, %s69_s16, [#allocation9], %s2544_s18, %s2544_s18, %s2545_s19  }
  0x18   :  { %s2546_s25 = smov [#allocation2]   ;;  %s2547_s27 = smov [#allocation7]  }
  0x19   :  { %s24_s26 = sshll.u32 %s2546_s25, 4  ;;  %s56_s28 = sshll.u32 %s2547_s27, 4  ;;  %s25_s26 = int_to_ptr.vmem [resolvable:$true] %s24_s26  ;;  %s57_s28 = int_to_ptr.vmem [resolvable:$true] %s56_s28 }
  0x1a   :  { %s2462_s29 = scalar_lea.vmem %s25_s26, 256  ;;  %p2467_p11 = scmp.lt.s32.totalorder %s25_s26, %s25_s26 }
  0x1b   :  { %p2463_p10 = scmp.ne.s32.totalorder %s25_s26, %s2462_s29  ;;  %p2468_p12 = scmp.lt.s32.totalorder %s2462_s29, %s2462_s29 }
  0x1d   :  { %p2469_p13 = por %p2468_p12, %p2467_p11 }
  0x1f   :  { %p2470_p0 = pnand %p2469_p13, %p2463_p10 }
  0x21   :  { %2473 = shalt.err (!%p2470_p0)
}
  0x22   :  { %30 = dma.hbm_to_vmem [thread:$0]  %s3434_s0, 256, %s25_s26, [#allocation3], %s2544_s18, %s2544_s18, %s2545_s19  }
  0x23   :  { %s2482_s11 = scalar_lea.vmem %s57_s28, 4096  ;;  %p2487_p2 = scmp.lt.s32.totalorder %s57_s28, %s57_s28 }
  0x24   :  { %p2483_p1 = scmp.ne.s32.totalorder %s57_s28, %s2482_s11  ;;  %p2488_p3 = scmp.lt.s32.totalorder %s2482_s11, %s2482_s11 }
  0x26   :  { %p2489_p4 = por %p2488_p3, %p2487_p2 }
  0x28   :  { %p2490_p5 = pnand %p2489_p4, %p2483_p1 }
  0x2a   :  { %2493 = shalt.err (!%p2490_p5)
}
  0x2b   :  { %s2548_s7 = smov 256   ;;  %s2549_s12 = smov 16  }
  0x2c   :  { %62 = dma.hbm_to_vmem [thread:$0]  %s3440_s6, 4096, %s57_s28, [#allocation6], %s2548_s7, %s2548_s7, %s2549_s12  }
  0x2d   :  { %s2550_s15 = smov [#allocation10]  }
  0x2e   :  { %s82_s16 = sshll.u32 %s2550_s15, 4  ;;  %s83_s16 = int_to_ptr.vmem [resolvable:$true] %s82_s16 }
  0x2f   :  { %s2502_s0 = scalar_lea.vmem %s83_s16, 1024  ;;  %p2507_p7 = scmp.lt.s32.totalorder %s83_s16, %s83_s16 }
  0x30   :  { %p2503_p6 = scmp.ne.s32.totalorder %s83_s16, %s2502_s0  ;;  %p2508_p8 = scmp.lt.s32.totalorder %s2502_s0, %s2502_s0 }
  0x32   :  { %p2509_p9 = por %p2508_p8, %p2507_p7 }
  0x34   :  { %p2510_p10 = pnand %p2509_p9, %p2503_p6 }
  0x36   :  { %2513 = shalt.err (!%p2510_p10)
}
  0x37   :  { %88 = dma.hbm_to_vmem [thread:$0]  %s3443_s9, 1024, %s83_s16, [#allocation9], %s2548_s7, %s2548_s7, %s2549_s12  }
  0x38   :  { %2534 = dma.done.wait [#allocation3], 256  }
  0x39   :  { %2535 = vsyncadd [#allocation3], 4294967040 }
  0x3a   :  { %2536 = dma.done.wait [#allocation6], 4352  }
  0x3b   :  { %2537 = vsyncadd [#allocation6], 4294962944 }
  0x3c   :  { %2538 = dma.done.wait [#allocation9], 1280  }
  0x3d   :  { %2539 = vsyncadd [#allocation9], 4294966016  ;;  %vm114_vm0 = vcmask 1043456   ;;  %v107_v0 = vld [vmem:[#allocation2 + $0x8] sm:$0xff]  ;;  %v105_v1 = vld [vmem:[#allocation2] sm:$0xff]  ;;  %s2551_s6 = smov 127   ;;  %v135_v36 = vlaneseq }
  0x3e   :  { %v2655_v2 = vsel %vm114_vm0, %v107_v0, 0.0  ;;  %v2658_v3 = vsel %vm114_vm0, %v105_v1, 0.0  ;;  %v2660_v4 = vcombine.high %v107_v0, %v107_v0  ;;  %v2662_v5 = vcombine.high %v105_v1, %v105_v1  ;;  %s2552_s9 = smov 126   ;;  %s2553_s20 = smov 125   ;;  %v2286_v10 = vld [vmem:[%s3439_s5 + $0x78] sm:$0xff]   ;;  %v2290_v14 = vld [vmem:[%s3439_s5 + $0x70] sm:$0xff]  }
  0x3f   :  { %265 = vrot.lane.b32.xlu1 %v2655_v2, %s2551_s6  ;;  %261 = vrot.lane.b32.xlu0 %v2658_v3, %s2551_s6  ;;  %v2287_v11 = vld [vmem:[%s3439_s5 + $0xf8] sm:$0xff]   ;;  %v2291_v15 = vld [vmem:[%s3439_s5 + $0xf0] sm:$0xff]   ;;  %v2771_v39 = vand.u32 127, %v135_v36  ;;  %s2555_s29 = smov 96   ;;  %s2556_s4 = smov 80   ;;  %vm2562_vm9 = vmmov 1  }
  0x40   :  { %v2670_v6 = vsel %vm114_vm0, %v2660_v4, 0.0  ;;  %v2674_v7 = vsel %vm114_vm0, %v2662_v5, 0.0  ;;  %v2288_v12 = vld [vmem:[%s3439_s5 + $0x38] sm:$0xff]   ;;  %2102 = vmatprep.subr.bf16.mxu0 %v2286_v10  ;;  %2124 = vmatprep.subr.bf16.mxu1 %v2287_v11  ;;  %v2292_v16 = vld [vmem:[%s3439_s5 + $0x30] sm:$0xff]   ;;  %v2294_v18 = vld [vmem:[%s3439_s5 + $0x68] sm:$0xff]   ;;  %s2557_s30 = smov 111  }
  0x41   :  { %v2228_v8 = vpack.i.bf16 %v2670_v6, %v2655_v2  ;;  %v2223_v9 = vpack.i.bf16 %v2674_v7, %v2658_v3  ;;  %v2289_v13 = vld [vmem:[%s3439_s5 + $0xb8] sm:$0xff]   ;;  %2103 = vmatpush3.bf16.msra.mxu0 %v2288_v12  ;;  %v2293_v17 = vld [vmem:[%s3439_s5 + $0xb0] sm:$0xff]   ;;  %v2295_v19 = vld [vmem:[%s3439_s5 + $0xe8] sm:$0xff]   ;;  %vm269_vm1 = vcmp.lt.s32.totalorder %v2771_v39, 127  ;;  %vm819_vm2 = vcmp.lt.s32.totalorder %v2771_v39, 126  ;;  %s2558_s11 = smov 113  }
  0x42   :  { %2125 = vmatpush3.bf16.msra.mxu1 %v2289_v13  ;;  %2104 = vmatprep.subr.bf16.mxu0 %v2290_v14  ;;  %v2296_v20 = vld [vmem:[%s3439_s5 + $0x28] sm:$0xff]   ;;  %v2298_v22 = vld [vmem:[%s3439_s5 + $0x60] sm:$0xff]   ;;  %v2302_v26 = vld [vmem:[%s3439_s5 + $0x58] sm:$0xff]   ;;  %vm836_vm3 = vcmp.lt.s32.totalorder %v2771_v39, 125  ;;  %s2559_s13 = smov 15   ;;  %s2560_s14 = smov 1  }
  0x43   :  { %267 = vrot.lane.b32.xlu1 %v2670_v6, %s2551_s6  ;;  %263 = vrot.lane.b32.xlu0 %v2674_v7, %s2551_s6  ;;  %v2297_v21 = vld [vmem:[%s3439_s5 + $0xa8] sm:$0xff]   ;;  %v2299_v23 = vld [vmem:[%s3439_s5 + $0xe0] sm:$0xff]   ;;  %s2561_s15 = smov 17   ;;  %vm335_vm4 = vcmp.lt.s32.totalorder %v2771_v39, 112  ;;  %vm869_vm5 = vcmp.lt.s32.totalorder %v2771_v39, 96  ;;  %vm886_vm6 = vcmp.lt.s32.totalorder %v2771_v39, 80  ;;  %vm3146_vm10 = vmpackc.low %vm2562_vm9, %vm114_vm0 }
  0x44   :  { %2126 = vmatprep.subr.bf16.mxu1 %v2291_v15  ;;  %v2300_v24 = vld [vmem:[%s3439_s5 + $0x20] sm:$0xff]   ;;  %v2303_v27 = vld [vmem:[%s3439_s5 + $0xd8] sm:$0xff]   ;;  %v2306_v30 = vld [vmem:[%s3439_s5 + $0x50] sm:$0xff]   ;;  %vm368_vm7 = vcmp.lt.s32.totalorder %v2771_v39, 111  ;;  %vm302_vm8 = vcmp.lt.s32.totalorder %v2771_v39, 113  ;;  %vm203_vm11 = vcmp.lt.s32.totalorder %v2771_v39, 15 }
  0x45   :  { %2105 = vmatpush3.bf16.msra.mxu0 %v2292_v16  ;;  %v2301_v25 = vld [vmem:[%s3439_s5 + $0xa0] sm:$0xff]   ;;  %v2304_v28 = vld [vmem:[%s3439_s5 + $0x18] sm:$0xff]   ;;  %v2307_v31 = vld [vmem:[%s3439_s5 + $0xd0] sm:$0xff]   ;;  %vm236_vm12 = vcmp.lt.s32.totalorder %v2771_v39, 1  ;;  %vm137_vm13 = vcmp.lt.s32.totalorder %v2771_v39, 17  ;;  %vm170_vm14 = vcmp.lt.s32.totalorder %v2771_v39, 16 }
  0x46   :  { %2127 = vmatpush3.bf16.msra.mxu1 %v2293_v17  ;;  %2106 = vmatprep.subr.bf16.mxu0 %v2294_v18  ;;  %v2305_v29 = vld [vmem:[%s3439_s5 + $0x98] sm:$0xff]   ;;  %v2308_v32 = vld [vmem:[%s3439_s5 + $0x10] sm:$0xff]   ;;  %v2310_v34 = vld [vmem:[%s3439_s5 + $0x48] sm:$0xff]   ;;  %s2564_s24 = smov 119   ;;  %s2565_s25 = smov 7   ;;  %vm1355_vm15 = vcmask 588800  }
  0x47   :  { %2229 = vrot.lane.b32.xlu1 %v2228_v8, %s2552_s9  ;;  %2224 = vrot.lane.b32.xlu0 %v2223_v9, %s2552_s9  ;;  %v2309_v33 = vld [vmem:[%s3439_s5 + $0x90] sm:$0xff]   ;;  %v2311_v35 = vld [vmem:[%s3439_s5 + $0xc8] sm:$0xff]   ;;  %s2566_s26 = smov 120   ;;  %s2571_s16 = smov 3   ;;  %vm1261_vm9 = vcmask 23552  }
  0x48   :  { %2128 = vmatprep.subr.bf16.mxu1 %v2295_v19  ;;  %v2312_v37 = vld [vmem:[%s3439_s5 + $0x8] sm:$0xff]   ;;  %v2314_v40 = vld [vmem:[%s3439_s5 + $0x40] sm:$0xff]   ;;  %v2318_v48 = vld [vmem:[%s3442_s8 + $0x78] sm:$0xff]   ;;  %s2572_s0 = smov 5  }
  0x49   :  { %2107 = vmatpush3.bf16.msra.mxu0 %v2296_v20  ;;  %v2313_v38 = vld [vmem:[%s3439_s5 + $0x88] sm:$0xff]   ;;  %v2315_v41 = vld [vmem:[%s3439_s5 + $0xc0] sm:$0xff]   ;;  %v2319_v49 = vld [vmem:[%s3442_s8 + $0xf8] sm:$0xff]  }
  0x4a   :  { %2129 = vmatpush3.bf16.msra.mxu1 %v2297_v21  ;;  %2108 = vmatprep.subr.bf16.mxu0 %v2298_v22  ;;  %v2316_v42 = vld [vmem:[%s3439_s5] sm:$0xff]  }
  0x4b   :  { %2239 = vrot.lane.b32.xlu1 %v2228_v8, %s2553_s20  ;;  %2234 = vrot.lane.b32.xlu0 %v2223_v9, %s2553_s20  ;;  %v2317_v45 = vld [vmem:[%s3439_s5 + $0x80] sm:$0xff]   ;;  %s2554_s5 = smov 112  }
  0x4c   :  { %2130 = vmatprep.subr.bf16.mxu1 %v2299_v23  ;;  %v2350_v39 = vld [vmem:[#allocation7 + $0xe0] ss:$16 sps:$4 sm:$0xff]  }
  0x4d   :  { %2109 = vmatpush3.bf16.msra.mxu0 %v2300_v24 }
  0x4e   :  { %2131 = vmatpush3.bf16.msra.mxu1 %v2301_v25  ;;  %2110 = vmatprep.subr.bf16.mxu0 %v2302_v26 }
  0x4f   :  { %2132 = vmatprep.subr.bf16.mxu1 %v2303_v27 }
  0x51   :  { %2111 = vmatpush3.bf16.msra.mxu0 %v2304_v28 }
  0x52   :  { %2133 = vmatpush3.bf16.msra.mxu1 %v2305_v29  ;;  %2112 = vmatprep.subr.bf16.mxu0 %v2306_v30 }
  0x53   :  { %2134 = vmatprep.subr.bf16.mxu1 %v2307_v31 }
  0x55   :  { %2113 = vmatpush3.bf16.msra.mxu0 %v2308_v32 }
  0x56   :  { %2135 = vmatpush3.bf16.msra.mxu1 %v2309_v33  ;;  %2114 = vmatprep.subr.bf16.mxu0 %v2310_v34 }
  0x57   :  { %2136 = vmatprep.subr.bf16.mxu1 %v2311_v35 }
  0x59   :  { %2115 = vmatpush3.bf16.msra.mxu0 %v2312_v37 }
  0x5a   :  { %2137 = vmatpush3.bf16.msra.mxu1 %v2313_v38  ;;  %2116 = vmatprep.subr.bf16.mxu0 %v2314_v40 }
  0x5b   :  { %2138 = vmatprep.subr.bf16.mxu1 %v2315_v41 }
  0x5d   :  { %2117 = vmatpush3.bf16.msra.mxu0 %v2316_v42 }
  0x5e   :  { %2139 = vmatpush3.bf16.msra.mxu1 %v2317_v45  ;;  %2146 = vmatprep.subr.bf16.mxu0 %v2318_v48 }
  0x5f   :  { %2168 = vmatprep.subr.bf16.mxu1 %v2319_v49 }
  0xb1   :  { %v266_v43 = vpop.permute.xlu1 %265  ;;  %v262_v44 = vpop.permute.xlu0 %261 }
  0xb5   :  { %v268_v46 = vpop.permute.xlu1 %267  ;;  %v264_v47 = vpop.permute.xlu0 %263 }
  0xb6   :  { %v2792_v50 = vsel %vm269_vm1, %v266_v43, %v268_v46  ;;  %v2794_v51 = vsel %vm269_vm1, %v268_v46, %v262_v44  ;;  %v2796_v52 = vsel %vm269_vm1, %v264_v47, %v266_v43  ;;  %v2798_v53 = vsel %vm269_vm1, %v262_v44, %v264_v47 }
  0xb7   :  { %v2802_v54 = vmax.f32 %v2655_v2, %v2792_v50  ;;  %v2806_v55 = vmax.f32 %v2670_v6, %v2794_v51  ;;  %v2810_v56 = vmax.f32 %v2658_v3, %v2798_v53  ;;  %v2814_v57 = vmax.f32 %v2674_v7, %v2796_v52 }
  0xb8   :  { %vm1311_vm1 = vcmask 220160  }
  0xb9   :  { %v2230_v58 = vpop.permute.xlu1 %2229  ;;  %v2225_v59 = vpop.permute.xlu0 %2224  ;;  %v2248_v60 = vpack.i.bf16 %v2806_v55, %v2802_v54  ;;  %v2243_v1 = vpack.i.bf16 %v2814_v57, %v2810_v56 }
  0xba   :  { %v2232_v61 = vunpack.i.h.bf16 %v2230_v58  ;;  %v2231_v62 = vunpack.i.l.bf16 %v2230_v58  ;;  %v2227_v63 = vunpack.i.h.bf16 %v2225_v59  ;;  %v2226_v0 = vunpack.i.l.bf16 %v2225_v59  ;;  %v2321_v58 = vld [vmem:[%s3442_s8 + $0xb8] sm:$0xff]  }
  0xbb   :  { %2249 = vrot.lane.b32.xlu1 %v2248_v60, %s2554_s5  ;;  %2244 = vrot.lane.b32.xlu0 %v2243_v1, %s2554_s5  ;;  %v2325_v1 = vld [vmem:[%s3442_s8 + $0xb0] sm:$0xff]  }
  0xbc   :  { %v820_v8 = vsel %vm819_vm2, %v2231_v62, %v2232_v61  ;;  %v821_v9 = vsel %vm819_vm2, %v2227_v63, %v2231_v62  ;;  %v822_v10 = vsel %vm819_vm2, %v2226_v0, %v2227_v63  ;;  %v823_v11 = vsel %vm819_vm2, %v2232_v61, %v2226_v0  ;;  %v2324_v0 = vld [vmem:[%s3442_s8 + $0x30] sm:$0xff]  }
  0xbd   :  { %v2240_v12 = vpop.permute.xlu1 %2239  ;;  %v2235_v13 = vpop.permute.xlu0 %2234  ;;  %v826_v18 = vmax.f32 %v2802_v54, %v820_v8  ;;  %v825_v19 = vmax.f32 %v2814_v57, %v821_v9  ;;  %v824_v20 = vmax.f32 %v2810_v56, %v822_v10  ;;  %v827_v21 = vmax.f32 %v2806_v55, %v823_v11  ;;  %v2326_v8 = vld [vmem:[%s3442_s8 + $0x68] sm:$0xff]  }
  0xbe   :  { %v2242_v14 = vunpack.i.h.bf16 %v2240_v12  ;;  %v2241_v15 = vunpack.i.l.bf16 %v2240_v12  ;;  %v2237_v16 = vunpack.i.h.bf16 %v2235_v13  ;;  %v2236_v17 = vunpack.i.l.bf16 %v2235_v13  ;;  %v2327_v9 = vld [vmem:[%s3442_s8 + $0xe8] sm:$0xff]  }
  0xbf   :  { %vm1301_vm2 = vcmask 228352  }
  0xc0   :  { %v837_v22 = vsel %vm836_vm3, %v2241_v15, %v2242_v14  ;;  %v838_v23 = vsel %vm836_vm3, %v2237_v16, %v2241_v15  ;;  %v839_v24 = vsel %vm836_vm3, %v2236_v17, %v2237_v16  ;;  %v840_v25 = vsel %vm836_vm3, %v2242_v14, %v2236_v17 }
  0xc1   :  { %v2828_v26 = vmax.f32 %v826_v18, %v837_v22  ;;  %v2830_v27 = vmax.f32 %v824_v20, %v839_v24  ;;  %v2832_v28 = vmax.f32 %v825_v19, %v838_v23  ;;  %v2834_v29 = vmax.f32 %v827_v21, %v840_v25  ;;  %v2328_v18 = vld [vmem:[%s3442_s8 + $0x28] sm:$0xff]   ;;  %v2330_v20 = vld [vmem:[%s3442_s8 + $0x60] sm:$0xff]  }
  0xc2   :  { %v2329_v19 = vld [vmem:[%s3442_s8 + $0xa8] sm:$0xff]   ;;  %v2331_v21 = vld [vmem:[%s3442_s8 + $0xe0] sm:$0xff]   ;;  %vm1291_vm3 = vcmask 236544  }
  0xc3   :  { %v2258_v30 = vpack.i.bf16 %v2834_v29, %v2828_v26  ;;  %v2253_v31 = vpack.i.bf16 %v2832_v28, %v2830_v27 }
  0xc5   :  { %2259 = vrot.lane.b32.xlu1 %v2258_v30, %s2554_s5  ;;  %2254 = vrot.lane.b32.xlu0 %v2253_v31, %s2554_s5 }
  0xc9   :  { %2269 = vrot.lane.b32.xlu1 %v2258_v30, %s2555_s29  ;;  %2264 = vrot.lane.b32.xlu0 %v2253_v31, %s2555_s29  ;;  %s2569_s29 = smov 123  }
  0xcd   :  { %2279 = vrot.lane.b32.xlu1 %v2258_v30, %s2556_s4  ;;  %2274 = vrot.lane.b32.xlu0 %v2253_v31, %s2556_s4  ;;  %s2570_s4 = smov 4  }
  0xd1   :  { %360 = vrot.lane.b32.xlu0 %v2658_v3, %s2557_s30  ;;  %362 = vrot.lane.b32.xlu1 %v2674_v7, %s2557_s30 }
  0xd5   :  { %364 = vrot.lane.b32.xlu0 %v2655_v2, %s2557_s30  ;;  %296 = vrot.lane.b32.xlu1 %v2674_v7, %s2558_s11 }
  0xd9   :  { %298 = vrot.lane.b32.xlu0 %v2655_v2, %s2558_s11  ;;  %329 = vrot.lane.b32.xlu1 %v2674_v7, %s2554_s5 }
  0xdd   :  { %331 = vrot.lane.b32.xlu0 %v2655_v2, %s2554_s5  ;;  %294 = vrot.lane.b32.xlu1 %v2658_v3, %s2558_s11 }
  0xe1   :  { %327 = vrot.lane.b32.xlu0 %v2658_v3, %s2554_s5  ;;  %195 = vrot.lane.b32.xlu1 %v2658_v3, %s2559_s13 }
  0xe5   :  { %197 = vrot.lane.b32.xlu0 %v2674_v7, %s2559_s13  ;;  %228 = vrot.lane.b32.xlu1 %v2658_v3, %s2560_s14 }
  0xe9   :  { %230 = vrot.lane.b32.xlu0 %v2674_v7, %s2560_s14  ;;  %201 = vrot.lane.b32.xlu1 %v2670_v6, %s2559_s13 }
  0xed   :  { %234 = vrot.lane.b32.xlu0 %v2670_v6, %s2560_s14  ;;  %127 = vrot.lane.b32.xlu1 %v2658_v3, %s2561_s15 }
  0xf1   :  { %129 = vrot.lane.b32.xlu0 %v2674_v7, %s2561_s15  ;;  %162 = vrot.lane.b32.xlu1 %v2658_v3, %s2549_s12 }
  0xf5   :  { %164 = vrot.lane.b32.xlu0 %v2674_v7, %s2549_s12  ;;  %133 = vrot.lane.b32.xlu1 %v2670_v6, %s2561_s15 }
  0xf9   :  { %168 = vrot.lane.b32.xlu0 %v2670_v6, %s2549_s12 }
 0x12d   :  { %v2250_v32 = vpop.permute.xlu1 %2249  ;;  %v2245_v35 = vpop.permute.xlu0 %2244 }
 0x12e   :  { %v2252_v33 = vunpack.i.h.bf16 %v2250_v32  ;;  %v2251_v34 = vunpack.i.l.bf16 %v2250_v32  ;;  %v2247_v37 = vunpack.i.h.bf16 %v2245_v35  ;;  %v2246_v38 = vunpack.i.l.bf16 %v2245_v35 }
 0x130   :  { %v405_v3 = vsel %vm335_vm4, %v2251_v34, %v2252_v33  ;;  %v406_v7 = vsel %vm335_vm4, %v2247_v37, %v2251_v34  ;;  %v408_v41 = vsel %vm335_vm4, %v2252_v33, %v2246_v38  ;;  %v407_v42 = vsel %vm335_vm4, %v2246_v38, %v2247_v37  ;;  %v2332_v37 = vld [vmem:[%s3442_s8 + $0x20] sm:$0xff]   ;;  %v2335_v38 = vld [vmem:[%s3442_s8 + $0xd8] sm:$0xff]  }
 0x131   :  { %v411_v40 = vmax.f32 %v2802_v54, %v405_v3  ;;  %v410_v43 = vmax.f32 %v2814_v57, %v406_v7  ;;  %v412_v44 = vmax.f32 %v2806_v55, %v408_v41  ;;  %v409_v45 = vmax.f32 %v2810_v56, %v407_v42  ;;  %v2320_v54 = vld [vmem:[%s3442_s8 + $0x38] sm:$0xff]   ;;  %v2322_v57 = vld [vmem:[%s3442_s8 + $0x70] sm:$0xff]  }
 0x132   :  { %v2323_v55 = vld [vmem:[%s3442_s8 + $0xf0] sm:$0xff]  }
 0x133   :  { %v415_v46 = vpack.c.bf16 %v411_v40, %v411_v40  ;;  %v414_v47 = vpack.c.bf16 %v410_v43, %v410_v43  ;;  %v416_v48 = vpack.c.bf16 %v412_v44, %v412_v44  ;;  %v413_v49 = vpack.c.bf16 %v409_v45, %v409_v45 }
 0x135   :  { %705 = vmatprep.mubr.bf16.mxu0 %v414_v47  ;;  %745 = vmatprep.mubr.bf16.mxu1 %v416_v48  ;;  %v2337_v47 = vld [vmem:[%s3442_s8 + $0x98] sm:$0xff]   ;;  %v3006_v48 = vshrl.u32 %v135_v36, 7 }
 0x136   :  { %706 = vmatmul.mubr.bf16.vlgmr.msra.gmra.mxu0 %v413_v49  ;;  %746 = vmatmul.mubr.bf16.vlgmr.msra.gmra.mxu1 %v415_v46  ;;  %v2336_v46 = vld [vmem:[%s3442_s8 + $0x18] sm:$0xff]  }
 0x137   :  { %v2909_v56 = vpop.permute.xlu1 %2259  ;;  %v2911_v59 = vpop.permute.xlu0 %2254  ;;  %2147 = vmatpush3.bf16.msra.mxu0 %v2320_v54  ;;  %2169 = vmatpush3.bf16.msra.mxu1 %v2321_v58  ;;  %v2338_v58 = vld [vmem:[%s3442_s8 + $0x50] sm:$0xff]  }
 0x138   :  { %v2262_v60 = vunpack.i.h.bf16 %v2909_v56  ;;  %v2261_v61 = vunpack.i.l.bf16 %v2909_v56  ;;  %v2257_v62 = vunpack.i.h.bf16 %v2911_v59  ;;  %v2256_v63 = vunpack.i.l.bf16 %v2911_v59  ;;  %2148 = vmatprep.subr.bf16.mxu0 %v2322_v57  ;;  %2170 = vmatprep.subr.bf16.mxu1 %v2323_v55  ;;  %v2339_v57 = vld [vmem:[%s3442_s8 + $0xd0] sm:$0xff]  }
 0x139   :  { %v2340_v56 = vld [vmem:[%s3442_s8 + $0x10] sm:$0xff]  }
 0x13a   :  { %v854_v10 = vsel %vm335_vm4, %v2257_v62, %v2261_v61  ;;  %v856_v11 = vsel %vm335_vm4, %v2262_v60, %v2256_v63 }
 0x13b   :  { %v2942_v12 = vpop.permute.xlu1 %2269  ;;  %v2944_v13 = vpop.permute.xlu0 %2264  ;;  %2149 = vmatpush3.bf16.msra.mxu0 %v2324_v0  ;;  %2171 = vmatpush3.bf16.msra.mxu1 %v2325_v1  ;;  %v858_v24 = vmax.f32 %v2832_v28, %v854_v10  ;;  %v860_v25 = vmax.f32 %v2834_v29, %v856_v11  ;;  %v2333_v28 = vld [vmem:[%s3442_s8 + $0xa0] sm:$0xff]   ;;  %v2334_v29 = vld [vmem:[%s3442_s8 + $0x58] sm:$0xff]   ;;  %v3018_v0 = vsub.s32 6, %v3006_v48  ;;  %v853_v1 = vsel %vm335_vm4, %v2261_v61, %v2262_v60  ;;  %v2341_v60 = vld [vmem:[%s3442_s8 + $0x90] sm:$0xff]  }
 0x13c   :  { %v2272_v14 = vunpack.i.h.bf16 %v2942_v12  ;;  %v2271_v15 = vunpack.i.l.bf16 %v2942_v12  ;;  %v2267_v16 = vunpack.i.h.bf16 %v2944_v13  ;;  %v2266_v17 = vunpack.i.l.bf16 %v2944_v13  ;;  %2150 = vmatprep.subr.bf16.mxu0 %v2326_v8  ;;  %2172 = vmatprep.subr.bf16.mxu1 %v2327_v9  ;;  %v1972_v9 = vld [vmem:[%s3437_s3 + $0x20] ss:$0 sm:$0xff]  ;;  %v1973_v61 = vld [vmem:[%s3437_s3 + $0x28] ss:$0 sm:$0xff] }
 0x13d   :  { %v855_v8 = vsel %vm335_vm4, %v2256_v63, %v2257_v62  ;;  %v2342_v63 = vld [vmem:[%s3442_s8 + $0x48] sm:$0xff]   ;;  %v3057_v11 = vsub.s32 7, %v3006_v48 }
 0x13e   :  { %v871_v22 = vsel %vm869_vm5, %v2267_v16, %v2271_v15  ;;  %v873_v23 = vsel %vm869_vm5, %v2272_v14, %v2266_v17  ;;  %v2343_v10 = vld [vmem:[%s3442_s8 + $0xc8] sm:$0xff]  }
 0x13f   :  { %v2280_v30 = vpop.permute.xlu1 %2279  ;;  %v2977_v31 = vpop.permute.xlu0 %2274  ;;  %2151 = vmatpush3.bf16.msra.mxu0 %v2328_v18  ;;  %2173 = vmatpush3.bf16.msra.mxu1 %v2329_v19  ;;  %v875_v3 = vmax.f32 %v858_v24, %v871_v22  ;;  %v877_v40 = vmax.f32 %v860_v25, %v873_v23  ;;  %v3062_v18 = vld [vmem:[%s3437_s3 + $0x8] sm:$0xff]  ;;  %v870_v19 = vsel %vm869_vm5, %v2271_v15, %v2272_v14 }
 0x140   :  { %v2282_v32 = vunpack.i.h.bf16 %v2280_v30  ;;  %v2281_v33 = vunpack.i.l.bf16 %v2280_v30  ;;  %v2277_v34 = vunpack.i.h.bf16 %v2977_v31  ;;  %v2276_v35 = vunpack.i.l.bf16 %v2977_v31  ;;  %2152 = vmatprep.subr.bf16.mxu0 %v2330_v20  ;;  %2174 = vmatprep.subr.bf16.mxu1 %v2331_v21  ;;  %v2346_v31 = vld [vmem:[%s3442_s8 + $0x40] sm:$0xff]  }
 0x141   :  { %v872_v20 = vsel %vm869_vm5, %v2266_v17, %v2267_v16  ;;  %v859_v21 = vmax.f32 %v2828_v26, %v853_v1  ;;  %v857_v22 = vmax.f32 %v2830_v27, %v855_v8  ;;  %v314_v12 = vrot.slane %v3062_v18, %v3018_v0  ;;  %v2344_v26 = vld [vmem:[%s3442_s8 + $0x8] sm:$0xff]  }
 0x142   :  { %v888_v7 = vsel %vm886_vm6, %v2277_v34, %v2281_v33  ;;  %v890_v41 = vsel %vm886_vm6, %v2282_v32, %v2276_v35  ;;  %v887_v23 = vsel %vm886_vm6, %v2281_v33, %v2282_v32  ;;  %v889_v13 = vsel %vm886_vm6, %v2276_v35, %v2277_v34  ;;  %v2345_v27 = vld [vmem:[%s3442_s8 + $0x88] sm:$0xff]   ;;  %v2347_v32 = vld [vmem:[%s3442_s8 + $0xc0] sm:$0xff]  }
 0x143   :  { %v2997_v42 = vpop.permute.xlu0 %360  ;;  %v892_v43 = vmax.f32 %v875_v3, %v888_v7  ;;  %v894_v44 = vmax.f32 %v877_v40, %v890_v41  ;;  %v363_v45 = vpop.permute.xlu1 %362  ;;  %2153 = vmatpush3.bf16.msra.mxu0 %v2332_v37  ;;  %2175 = vmatpush3.bf16.msra.mxu1 %v2333_v28  ;;  %v876_v17 = vmax.f32 %v859_v21, %v870_v19  ;;  %v3102_v33 = vsub.s32 5, %v3006_v48  ;;  %v3107_v34 = vld [vmem:[%s3437_s3] sm:$0xff] }
 0x144   :  { %2154 = vmatprep.subr.bf16.mxu0 %v2334_v29  ;;  %2176 = vmatprep.subr.bf16.mxu1 %v2335_v38  ;;  %v371_v59 = vsel %vm368_vm7, %v2997_v42, %v363_v45  ;;  %v874_v25 = vmax.f32 %v857_v22, %v872_v20  ;;  %v347_v30 = vrot.slane %v3062_v18, %v3057_v11  ;;  %vm1281_vm5 = vcmask 252928  }
 0x145   :  { %v896_v49 = vpack.c.bf16 %v892_v43, %v892_v43  ;;  %v898_v54 = vpack.c.bf16 %v894_v44, %v894_v44  ;;  %v389_v24 = vmul.f32 %v1972_v9, %v371_v59  ;;  %v893_v37 = vmax.f32 %v876_v17, %v887_v23  ;;  %v2348_v44 = vld [vmem:[%s3442_s8] sm:$0xff]  }
 0x146   :  { %v891_v28 = vmax.f32 %v874_v25, %v889_v13  ;;  %v310_v38 = vrot.slane %v3107_v34, %v3018_v0  ;;  %v343_v40 = vrot.slane %v3107_v34, %v3057_v11  ;;  %v277_v59 = vrot.slane %v3107_v34, %v3102_v33 }
 0x147   :  { %1187 = vmatprep.mubr.bf16.mxu0 %v896_v49  ;;  %1227 = vmatprep.mubr.bf16.mxu1 %v898_v54  ;;  %v3015_v55 = vpop.permute.xlu0 %364  ;;  %v297_v36 = vpop.permute.xlu1 %296  ;;  %v1342_v7 = vpack.c.bf16 %v389_v24, %v389_v24  ;;  %v281_v54 = vrot.slane %v3062_v18, %v3102_v33  ;;  %v3167_v13 = vsub.s32 3, %v3006_v48  ;;  %vm1271_vm6 = vcmask 7168  }
 0x148   :  { %2155 = vmatpush3.bf16.msra.mxu0 %v2336_v46  ;;  %2177 = vmatpush3.bf16.msra.mxu1 %v2337_v47  ;;  %v370_v62 = vsel %vm368_vm7, %v363_v45, %v3015_v55  ;;  %v2349_v45 = vld [vmem:[%s3442_s8 + $0x80] sm:$0xff]   ;;  %v895_v8 = vpack.c.bf16 %v891_v28, %v891_v28  ;;  %s2563_s8 = smov 121  }
 0x149   :  { %2156 = vmatprep.subr.bf16.mxu0 %v2338_v58  ;;  %2178 = vmatprep.subr.bf16.mxu1 %v2339_v57  ;;  %v390_v16 = vmul.f32 %v1973_v61, %v370_v62  ;;  %v291_v61 = vmul.f32 %v281_v54, %v2796_v52  ;;  %v2412_v52 = vld [vmem:[#allocation2] sm:$0xff]  ;;  %v248_v25 = vrot.slane %v3062_v18, %v3167_v13 }
 0x14b   :  { %v3083_v14 = vpop.permute.xlu0 %298  ;;  %v330_v15 = vpop.permute.xlu1 %329  ;;  %v1343_v41 = vpack.c.bf16 %v390_v16, %v390_v16  ;;  %v2044_v19 = vpack.c.bf16 %v291_v61, %v2662_v5  ;;  %v3164_v5 = vsub.s32 2, %v3006_v48 }
 0x14c   :  { %2157 = vmatpush3.bf16.msra.mxu0 %v2340_v56  ;;  %2179 = vmatpush3.bf16.msra.mxu1 %v2341_v60  ;;  %v304_v35 = vsel %vm302_vm8, %v297_v36, %v3083_v14  ;;  %v897_v56 = vpack.c.bf16 %v893_v37, %v893_v37  ;;  %v1360_v60 = vsel %vm114_vm0, %v1342_v7, 0  ;;  %v3196_v7 = vsub.s32 0, %v3006_v48 }
 0x14d   :  { %2158 = vmatprep.subr.bf16.mxu0 %v2342_v63  ;;  %2180 = vmatprep.subr.bf16.mxu1 %v2343_v10  ;;  %v324_v46 = vmul.f32 %v314_v12, %v304_v35  ;;  %v290_v63 = vmul.f32 %v277_v59, %v2798_v53  ;;  %v215_v17 = vrot.slane %v3062_v18, %v3164_v5  ;;  %v2383_v10 = vld [vmem:[#allocation7 + $0x48] ss:$16 sps:$4 sm:$0xff]  }
 0x14f   :  { %v3112_v29 = vpop.permute.xlu0 %331  ;;  %v3116_v3 = vpop.permute.xlu1 %294  ;;  %v2047_v20 = vpack.c.bf16 %v290_v63, %v2412_v52 }
 0x150   :  { %2159 = vmatpush3.bf16.msra.mxu0 %v2344_v26  ;;  %2181 = vmatpush3.bf16.msra.mxu1 %v2345_v27  ;;  %v337_v43 = vsel %vm335_vm4, %v330_v15, %v3112_v29  ;;  %v305_v49 = vsel %vm302_vm8, %v3116_v3, %v297_v36  ;;  %v211_v26 = vrot.slane %v3107_v34, %v3164_v5 }
 0x151   :  { %v357_v47 = vmul.f32 %v347_v30, %v337_v43  ;;  %2160 = vmatprep.subr.bf16.mxu0 %v2346_v31  ;;  %2182 = vmatprep.subr.bf16.mxu1 %v2347_v32  ;;  %v323_v57 = vmul.f32 %v310_v38, %v305_v49  ;;  %v244_v27 = vrot.slane %v3107_v34, %v3167_v13 }
 0x152   :  { %v145_v49 = vrot.slane %v3107_v34, %v3196_v7 }
 0x153   :  { %v3134_v58 = vpop.permute.xlu0 %327  ;;  %v1337_v36 = vpack.c.bf16 %v357_v47, %v324_v46  ;;  %v196_v21 = vpop.permute.xlu1 %195  ;;  %v149_v46 = vrot.slane %v3062_v18, %v3196_v7 }
 0x154   :  { %2161 = vmatpush3.bf16.msra.mxu0 %v2348_v44  ;;  %2183 = vmatpush3.bf16.msra.mxu1 %v2349_v45  ;;  %v338_v1 = vsel %vm335_vm4, %v3134_v58, %v330_v15  ;;  %v3199_v44 = vsub.s32 1, %v3006_v48 }
 0x155   :  { %v356_v9 = vmul.f32 %v343_v40, %v338_v1  ;;  %2042 = vmatprep.subr.msk.bf16.mxu0 %vm114_vm0, %v1343_v41 }
 0x156   :  { %v182_v47 = vrot.slane %v3062_v18, %v3199_v44  ;;  %v178_v48 = vrot.slane %v3107_v34, %v3199_v44 }
 0x157   :  { %1188 = vmatmul.mubr.bf16.vlgmr.msra.gmra.mxu0 %v895_v8  ;;  %1228 = vmatmul.mubr.bf16.vlgmr.msra.gmra.mxu1 %v897_v56  ;;  %v1336_v62 = vpack.c.bf16 %v356_v9, %v323_v57  ;;  %v3155_v22 = vpop.permute.xlu0 %197  ;;  %v229_v53 = vpop.permute.xlu1 %228 }
 0x158   :  { %1384 = vmatpush1.bf16.msra.mxu0 %v1360_v60  ;;  %v206_v32 = vsel %vm203_vm11, %v196_v21, %v3155_v22 }
 0x159   :  { %1385 = vmatprep.subr.bf16.mxu0 %v1337_v36  ;;  %v225_v41 = vmul.f32 %v215_v17, %v206_v32 }
 0x15b   :  { %v3157_v23 = vpop.permute.xlu0 %230  ;;  %v3159_v12 = vpop.permute.xlu1 %201 }
 0x15c   :  { %1386 = vmatpush1.bf16.msra.mxu0 %v1336_v62  ;;  %v207_v30 = vsel %vm203_vm11, %v3159_v12, %v196_v21  ;;  %v239_v35 = vsel %vm236_vm12, %v229_v53, %v3157_v23 }
 0x15d   :  { %2045 = vmatprep.subr.msk.bf16.mxu0 %vm3146_vm10, %v2044_v19  ;;  %v224_v38 = vmul.f32 %v211_v26, %v207_v30  ;;  %v258_v43 = vmul.f32 %v248_v25, %v239_v35  ;;  %v2567_v30 = vmov 0  }
 0x15e   :  { %1409 = vmatprep.mubr.bf16.mxu0 %v2567_v30  ;;  %1450 = vmatprep.mubr.bf16.mxu1 %v2567_v30 }
 0x15f   :  { %v3161_v15 = vpop.permute.xlu0 %234  ;;  %v128_v24 = vpop.permute.xlu1 %127  ;;  %v1325_v1 = vpack.c.bf16 %v258_v43, %v225_v41  ;;  %2283 = vset.pattern.permute.xlu0 %v2567_v30 }
 0x160   :  { %2048 = vmatpush1.bf16.msk.msra.mxu0 %vm3146_vm10, %v2047_v20  ;;  %v240_v31 = vsel %vm236_vm12, %v3161_v15, %v229_v53 }
 0x161   :  { %v257_v40 = vmul.f32 %v244_v27, %v240_v31  ;;  %1389 = vmatprep.subr.bf16.mxu0 %v1325_v1  ;;  %v3239_v31 = vld [vmem:[%s3435_s1] sm:$0x3]  ;;  %s2568_s1 = smov 124  }
 0x163   :  { %v3169_v16 = vpop.permute.xlu0 %129  ;;  %v163_v37 = vpop.permute.xlu1 %162  ;;  %v1324_v45 = vpack.c.bf16 %v257_v40, %v224_v38 }
 0x164   :  { %v140_v8 = vsel %vm137_vm13, %v128_v24, %v3169_v16 }
 0x165   :  { %1390 = vmatpush1.bf16.msra.mxu0 %v1324_v45  ;;  %v159_v36 = vmul.f32 %v149_v46, %v140_v8 }
 0x167   :  { %v3193_v28 = vpop.permute.xlu0 %164  ;;  %v3209_v54 = vpop.permute.xlu1 %133 }
 0x168   :  { %v173_v9 = vsel %vm170_vm14, %v163_v37, %v3193_v28  ;;  %v141_v18 = vsel %vm137_vm13, %v3209_v54, %v128_v24 }
 0x169   :  { %v192_v59 = vmul.f32 %v182_v47, %v173_v9  ;;  %v158_v61 = vmul.f32 %v145_v49, %v141_v18  ;;  %v2008_v18 = vld [vmem:[#allocation5 + $0x8] ss:$0 sm:$0xff] }
 0x16b   :  { %v3213_v57 = vpop.permute.xlu0 %168  ;;  %v1319_v24 = vpack.c.bf16 %v192_v59, %v159_v36  ;;  %v3281_v36 = vld [vmem:[#allocation8] sm:$0xff]  ;;  %v3283_v59 = vld [vmem:[#allocation5] sm:$0xff] }
 0x16c   :  { %v174_v56 = vsel %vm170_vm14, %v3213_v57, %v163_v37 }
 0x16d   :  { %v191_v62 = vmul.f32 %v178_v48, %v174_v56  ;;  %1391 = vmatprep.subr.bf16.mxu0 %v1319_v24  ;;  %v1349_v48 = vld [vmem:[%s3436_s2] sm:$0xf] }
 0x16f   :  { %v1318_v26 = vpack.c.bf16 %v191_v62, %v158_v61  ;;  %v802_v62 = vrot.slane %v3283_v59, %v3057_v11 }
 0x171   :  { %1392 = vmatpush1.bf16.msra.mxu0 %v1318_v26 }
 0x174   :  { %2049 = vmatmul.mubr.msk.bf16.vlgmr.msra.gmra.mxu0 %vm1355_vm15, %v3239_v31 }
 0x175   :  { %1491 = vmatprep.mubr.bf16.mxu0 %v2567_v30 }
 0x1f6   :  { %v2118_v34 = vpop.f32.mrf.mxu0  ;;  %v2140_v60 = vpop.f32.mrf.mxu1 }
 0x1f8   :  { %v2119_v63 = vpop.f32.mrf.mxu0  ;;  %v2141_v19 = vpop.f32.mrf.mxu1 }
 0x1f9   :  { %v2120_v52 = vadd.f32 %v2119_v63, %v2118_v34  ;;  %v2142_v20 = vadd.f32 %v2141_v19, %v2140_v60  ;;  %v1306_v63 = vrot.slane %v3281_v36, %v3057_v11 }
 0x1fa   :  { %v2121_v21 = vpop.f32.mrf.mxu0  ;;  %v2143_v53 = vpop.f32.mrf.mxu1 }
 0x1fb   :  { %v3227_v27 = vadd.f32 %v2142_v20, %v2120_v52  ;;  %v1296_v21 = vrot.slane %v3281_v36, %v3018_v0  ;;  %v795_v53 = vrot.slane %v3283_v59, %v3018_v0 }
 0x1fc   :  { %v2122_v17 = vpop.f32.mrf.mxu0  ;;  %v2144_v25 = vpop.f32.mrf.mxu1 }
 0x1fd   :  { %790 = vrot.lane.b32.xlu1 %v3227_v27, %s2563_s8  ;;  %804 = vrot.lane.b32.xlu0 %v3227_v27, %s2564_s24 }
 0x201   :  { %769 = vrot.lane.b32.xlu1 %v3227_v27, %s2565_s25  ;;  %797 = vrot.lane.b32.xlu0 %v3227_v27, %s2566_s26 }
 0x205   :  { %783 = vrot.lane.b32.xlu0 %v3227_v27, %s2551_s6 }
 0x217   :  { %v2162_v32 = vpop.f32.mrf.mxu0  ;;  %v2184_v35 = vpop.f32.mrf.mxu1 }
 0x219   :  { %v2163_v37 = vpop.f32.mrf.mxu0  ;;  %v2185_v38 = vpop.f32.mrf.mxu1 }
 0x21a   :  { %v2164_v40 = vadd.f32 %v2163_v37, %v2162_v32  ;;  %v2186_v41 = vadd.f32 %v2185_v38, %v2184_v35  ;;  %v788_v35 = vrot.slane %v3283_v59, %v3102_v33 }
 0x21b   :  { %v2165_v43 = vpop.f32.mrf.mxu0  ;;  %v2187_v45 = vpop.f32.mrf.mxu1 }
 0x21c   :  { %v3246_v46 = vadd.f32 %v2186_v41, %v2164_v40  ;;  %v1286_v43 = vrot.slane %v3281_v36, %v3102_v33 }
 0x21d   :  { %v2166_v47 = vpop.f32.mrf.mxu0  ;;  %v2188_v49 = vpop.f32.mrf.mxu1 }
 0x21e   :  { %1298 = vrot.lane.b32.xlu0 %v3246_v46, %s2568_s1  ;;  %1308 = vrot.lane.b32.xlu1 %v3246_v46, %s2569_s29 }
 0x222   :  { %776 = vrot.lane.b32.xlu0 %v3227_v27, %s2560_s14  ;;  %1288 = vrot.lane.b32.xlu1 %v3246_v46, %s2553_s20  ;;  %s2573_s20 = smov 9  }
 0x226   :  { %1268 = vrot.lane.b32.xlu0 %v3246_v46, %s2560_s14  ;;  %1278 = vrot.lane.b32.xlu1 %v3246_v46, %s2551_s6 }
 0x22a   :  { %1248 = vrot.lane.b32.xlu0 %v3246_v46, %s2570_s4  ;;  %1258 = vrot.lane.b32.xlu1 %v3246_v46, %s2571_s16 }
 0x22e   :  { %762 = vrot.lane.b32.xlu0 %v3227_v27, %s2545_s19  ;;  %1238 = vrot.lane.b32.xlu1 %v3246_v46, %s2572_s0 }
 0x232   :  { %300 = vrot.lane.b32.xlu0 %v2670_v6, %s2558_s11  ;;  %755 = vrot.lane.b32.xlu1 %v3227_v27, %s2573_s20 }
 0x236   :  { %199 = vrot.lane.b32.xlu0 %v2655_v2, %s2559_s13  ;;  %366 = vrot.lane.b32.xlu1 %v2670_v6, %s2557_s30 }
 0x23a   :  { %131 = vrot.lane.b32.xlu0 %v2655_v2, %s2561_s15  ;;  %333 = vrot.lane.b32.xlu1 %v2670_v6, %s2554_s5  ;;  %v2041_v6 = vld [vmem:[#allocation8 + $0x8] ss:$0 sm:$0xff] }
 0x23e   :  { %232 = vrot.lane.b32.xlu1 %v2655_v2, %s2560_s14  ;;  %1352 = vperm.xlu0 %2283, %v1349_v48  }
 0x242   :  { %166 = vrot.lane.b32.xlu1 %v2655_v2, %s2549_s12 }
 0x26f   :  { %v805_v1 = vpop.permute.xlu0 %804  ;;  %v791_v8 = vpop.permute.xlu1 %790 }
 0x270   :  { %v810_v60 = vmul.f32 %v2008_v18, %v805_v1  ;;  %v796_v45 = vmul.f32 %v795_v53, %v791_v8  ;;  %v781_v18 = vrot.slane %v3283_v59, %v3167_v13  ;;  %v1266_v8 = vrot.slane %v3281_v36, %v3164_v5 }
 0x272   :  { %v1346_v52 = vpack.c.bf16 %v810_v60, %v810_v60 }
 0x273   :  { %v798_v9 = vpop.permute.xlu0 %797  ;;  %v770_v56 = vpop.permute.xlu1 %769 }
 0x274   :  { %v803_v32 = vmul.f32 %v802_v62, %v798_v9  ;;  %v1372_v38 = vsel %vm114_vm0, %v1346_v52, 0 }
 0x276   :  { %v1340_v1 = vpack.c.bf16 %v803_v32, %v796_v45 }
 0x277   :  { %v784_v34 = vpop.permute.xlu0 %783 }
 0x278   :  { %v789_v9 = vmul.f32 %v788_v35, %v784_v34 }
 0x27a   :  { %v1334_v52 = vpack.c.bf16 %v789_v9, %v3227_v27  ;;  %v767_v27 = vrot.slane %v3283_v59, %v3199_v44 }
 0x290   :  { %v1299_v2 = vpop.permute.xlu0 %1298  ;;  %v1309_v61 = vpop.permute.xlu1 %1308 }
 0x291   :  { %v1312_v19 = vsel %vm1311_vm1, %v1309_v61, 0.0  ;;  %v1302_v26 = vsel %vm1301_vm2, %v1299_v2, 0.0  ;;  %v774_v61 = vrot.slane %v3283_v59, %v3164_v5  ;;  %vm1251_vm1 = vcmask 31744  }
 0x292   :  { %v1317_v20 = vmul.f32 %v2041_v6, %v1312_v19  ;;  %v1307_v40 = vmul.f32 %v1306_v63, %v1302_v26  ;;  %v1276_v6 = vrot.slane %v3281_v36, %v3167_v13  ;;  %vm1241_vm2 = vcmask 39936  }
 0x293   :  { %v775_v32 = vmul.f32 %v774_v61, %v770_v56 }
 0x294   :  { %v1347_v24 = vpack.c.bf16 %v1317_v20, %v1317_v20  ;;  %v777_v17 = vpop.permute.xlu0 %776  ;;  %v1289_v25 = vpop.permute.xlu1 %1288 }
 0x295   :  { %v1292_v37 = vsel %vm1291_vm3, %v1289_v25, 0.0  ;;  %v782_v20 = vmul.f32 %v781_v18, %v777_v17  ;;  %v1246_v25 = vrot.slane %v3281_v36, %v3196_v7  ;;  %v1974_v18 = vld [vmem:[%s3437_s3 + $0x30] ss:$0 sm:$0xff] }
 0x296   :  { %v1297_v41 = vmul.f32 %v1296_v21, %v1292_v37  ;;  %2058 = vmatprep.subr.msk.bf16.mxu0 %vm114_vm0, %v1347_v24  ;;  %v1256_v21 = vrot.slane %v3281_v36, %v3199_v44 }
 0x297   :  { %1466 = vmatpush1.bf16.msra.mxu0 %v1372_v38  ;;  %v1328_v38 = vpack.c.bf16 %v782_v20, %v775_v32 }
 0x298   :  { %v1341_v47 = vpack.c.bf16 %v1307_v40, %v1297_v41  ;;  %v1269_v49 = vpop.permute.xlu0 %1268  ;;  %v1279_v48 = vpop.permute.xlu1 %1278  ;;  %v760_v41 = vrot.slane %v3283_v59, %v3196_v7  ;;  %v1975_v59 = vld [vmem:[%s3437_s3 + $0x38] ss:$0 sm:$0xff] }
 0x299   :  { %v1282_v60 = vsel %vm1281_vm5, %v1279_v48, 0.0  ;;  %v1272_v62 = vsel %vm1271_vm6, 0.0, %v1269_v49  ;;  %v2355_v48 = vld [vmem:[#allocation7 + $0xec] ss:$16 sps:$4 sm:$0xff]  }
 0x29a   :  { %v1287_v2 = vmul.f32 %v1286_v43, %v1282_v60  ;;  %1467 = vmatprep.subr.bf16.mxu0 %v1341_v47  ;;  %v1277_v26 = vmul.f32 %v1276_v6, %v1272_v62  ;;  %v3326_v60 = vld [vmem:[%s3437_s3 + $0x10] sm:$0xff]  ;;  %v3331_v6 = vld [vmem:[%s3437_s3 + $0x18] sm:$0xff]  ;;  %s2574_s3 = smov [#allocation11]  }
 0x29b   :  { %1468 = vmatpush1.bf16.msra.mxu0 %v1340_v1  ;;  %v322_v61 = vrot.slane %v3331_v6, %v3018_v0  ;;  %v351_v20 = vrot.slane %v3326_v60, %v3057_v11  ;;  %s1958_s18 = sshll.u32 %s2574_s3, 4  ;;  %s1959_s18 = int_to_ptr.vmem [resolvable:$true] %s1958_s18 }
 0x29c   :  { %v1335_v34 = vpack.c.bf16 %v1287_v2, %v3246_v46  ;;  %v1249_v63 = vpop.permute.xlu0 %1248  ;;  %v1259_v19 = vpop.permute.xlu1 %1258  ;;  %s2514_s9 = scalar_lea.vmem %s1959_s18, 1024  ;;  %p2519_p12 = scmp.lt.s32.totalorder %s1959_s18, %s1959_s18 }
 0x29d   :  { %v1262_v53 = vsel %vm1261_vm9, 0.0, %v1259_v19  ;;  %v1252_v35 = vsel %vm1251_vm1, 0.0, %v1249_v63  ;;  %v2353_v63 = vld [vmem:[#allocation7 + $0xe8] ss:$16 sps:$4 sm:$0xff]   ;;  %p2515_p11 = scmp.ne.s32.totalorder %s1959_s18, %s2514_s9  ;;  %p2520_p13 = scmp.lt.s32.totalorder %s2514_s9, %s2514_s9 }
 0x29e   :  { %v1267_v24 = vmul.f32 %v1266_v8, %v1262_v53  ;;  %1469 = vmatprep.subr.bf16.mxu0 %v1335_v34  ;;  %v1257_v43 = vmul.f32 %v1256_v21, %v1252_v35  ;;  %v318_v8 = vrot.slane %v3326_v60, %v3018_v0  ;;  %v355_v21 = vrot.slane %v3331_v6, %v3057_v11  ;;  %v2361_v53 = vld [vmem:[#allocation7 + $0xcc] ss:$16 sps:$4 sm:$0xff]  }
 0x29f   :  { %1470 = vmatpush1.bf16.msra.mxu0 %v1334_v52  ;;  %v289_v0 = vrot.slane %v3331_v6, %v3102_v33  ;;  %v285_v11 = vrot.slane %v3326_v60, %v3102_v33  ;;  %p2521_p0 = por %p2520_p13, %p2519_p12 }
 0x2a0   :  { %v1329_v46 = vpack.c.bf16 %v1277_v26, %v1267_v24  ;;  %v1239_v37 = vpop.permute.xlu1 %1238  ;;  %v763_v17 = vpop.permute.xlu0 %762 }
 0x2a1   :  { %v1242_v40 = vsel %vm1241_vm2, 0.0, %v1239_v37  ;;  %v768_v56 = vmul.f32 %v767_v27, %v763_v17  ;;  %v2367_v17 = vld [vmem:[#allocation7 + $0xac] ss:$16 sps:$4 sm:$0xff]   ;;  %v293_v33 = vmul.f32 %v289_v0, %v2794_v51  ;;  %v2365_v51 = vld [vmem:[#allocation7 + $0xa8] ss:$16 sps:$4 sm:$0xff]   ;;  %p2522_p1 = pnand %p2521_p0, %p2515_p11 }
 0x2a2   :  { %v1247_v45 = vmul.f32 %v1246_v25, %v1242_v40  ;;  %1471 = vmatprep.subr.bf16.mxu0 %v1329_v46 }
 0x2a3   :  { %1472 = vmatpush1.bf16.msra.mxu0 %v1328_v38 }
 0x2a4   :  { %v1323_v47 = vpack.c.bf16 %v1257_v43, %v1247_v45  ;;  %v756_v36 = vpop.permute.xlu1 %755  ;;  %v301_v1 = vpop.permute.xlu0 %300  ;;  %v223_v45 = vrot.slane %v3331_v6, %v3164_v5 }
 0x2a5   :  { %v761_v49 = vmul.f32 %v760_v41, %v756_v36  ;;  %v292_v36 = vmul.f32 %v285_v11, %v2792_v50  ;;  %v190_v50 = vrot.slane %v3331_v6, %v3199_v44  ;;  %v2364_v11 = vld [vmem:[#allocation7 + $0xa4] ss:$16 sps:$4 sm:$0xff]  }
 0x2a6   :  { %1473 = vmatprep.subr.bf16.mxu0 %v1323_v47 }
 0x2a7   :  { %v1322_v9 = vpack.c.bf16 %v768_v56, %v761_v49  ;;  %v252_v49 = vrot.slane %v3326_v60, %v3167_v13 }
 0x2a8   :  { %v367_v2 = vpop.permute.xlu1 %366  ;;  %v200_v32 = vpop.permute.xlu0 %199 }
 0x2a9   :  { %v369_v62 = vsel %vm368_vm7, %v3015_v55, %v367_v2  ;;  %v372_v34 = vsel %vm368_vm7, %v367_v2, %v2997_v42  ;;  %1474 = vmatpush1.bf16.msra.mxu0 %v1322_v9  ;;  %v303_v55 = vsel %vm302_vm8, %v3083_v14, %v301_v1  ;;  %v306_v42 = vsel %vm302_vm8, %v301_v1, %v3116_v3  ;;  %v2359_v3 = vld [vmem:[#allocation7 + $0xc8] ss:$16 sps:$4 sm:$0xff]  }
 0x2aa   :  { %v391_v19 = vmul.f32 %v1974_v18, %v369_v62  ;;  %v392_v52 = vmul.f32 %v1975_v59, %v372_v34  ;;  %1745 = vmatprep.subr.bf16.mxu0 %v2355_v48  ;;  %v325_v46 = vmul.f32 %v318_v8, %v303_v55  ;;  %v326_v37 = vmul.f32 %v322_v61, %v306_v42  ;;  %v2373_v48 = vld [vmem:[#allocation7 + $0x8c] ss:$16 sps:$4 sm:$0xff]   ;;  %v2371_v8 = vld [vmem:[#allocation7 + $0x88] ss:$16 sps:$4 sm:$0xff]  }
 0x2ab   :  { %v204_v56 = vsel %vm203_vm11, %v200_v32, %v3159_v12  ;;  %v2052_v1 = vpack.c.bf16 %v293_v33, %v2660_v4  ;;  %v219_v12 = vrot.slane %v3326_v60, %v3164_v5  ;;  %v205_v4 = vsel %vm203_vm11, %v3155_v22, %v200_v32  ;;  %v2413_v5 = vld [vmem:[#allocation2 + $0x8] sm:$0xff]  ;;  %v2362_v32 = vld [vmem:[#allocation7 + $0xa0] ss:$16 sps:$4 sm:$0xff]  }
 0x2ac   :  { %v1344_v26 = vpack.c.bf16 %v391_v19, %v391_v19  ;;  %v1345_v24 = vpack.c.bf16 %v392_v52, %v392_v52  ;;  %2059 = vmatmul.mubr.msk.bf16.vlgmr.msra.gmra.mxu0 %vm1355_vm15, %v3239_v31  ;;  %v334_v25 = vpop.permute.xlu1 %333  ;;  %v132_v9 = vpop.permute.xlu0 %131  ;;  %v227_v2 = vmul.f32 %v223_v45, %v204_v56  ;;  %v2055_v61 = vpack.c.bf16 %v292_v36, %v2413_v5  ;;  %v2379_v34 = vld [vmem:[#allocation7 + $0x6c] ss:$16 sps:$4 sm:$0xff]   ;;  %v2386_v45 = vld [vmem:[#allocation7 + $0x20] ss:$16 sps:$4 sm:$0xff]  }
 0x2ad   :  { %v336_v35 = vsel %vm335_vm4, %v3112_v29, %v334_v25  ;;  %v339_v14 = vsel %vm335_vm4, %v334_v25, %v3134_v58  ;;  %1746 = vmatpush1.bf16.msra.mxu0 %v2353_v63  ;;  %v256_v29 = vrot.slane %v3331_v6, %v3167_v13  ;;  %1777 = vmatprep.mubr.bf16.mxu0 %v2567_v30  ;;  %v2356_v25 = vld [vmem:[#allocation7 + $0xc0] ss:$16 sps:$4 sm:$0xff]   ;;  %v2397_v36 = vld [vmem:[#allocation7 + $0xc] ss:$16 sps:$4 sm:$0xff]  }
 0x2ae   :  { %v358_v38 = vmul.f32 %v351_v20, %v336_v35  ;;  %v359_v27 = vmul.f32 %v355_v21, %v339_v14  ;;  %2050 = vmatprep.subr.msk.bf16.mxu1 %vm114_vm0, %v1345_v24  ;;  %v1366_v40 = vsel %vm114_vm0, %v1344_v26, 0  ;;  %1747 = vmatprep.subr.bf16.mxu0 %v2361_v53  ;;  %v157_v13 = vrot.slane %v3331_v6, %v3196_v7  ;;  %v2377_v21 = vld [vmem:[#allocation7 + $0x68] ss:$16 sps:$4 sm:$0xff]   ;;  %v2391_v26 = vld [vmem:[#allocation7 + $0x2c] ss:$16 sps:$4 sm:$0xff]  }
 0x2af   :  { %1425 = vmatpush1.bf16.msra.mxu1 %v1366_v40  ;;  %v138_v6 = vsel %vm137_vm13, %v132_v9, %v3209_v54  ;;  %v186_v22 = vrot.slane %v3326_v60, %v3199_v44  ;;  %v226_v52 = vmul.f32 %v219_v12, %v205_v4  ;;  %v153_v20 = vrot.slane %v3326_v60, %v3196_v7  ;;  %v2352_v7 = vld [vmem:[#allocation7 + $0xe4] ss:$16 sps:$4 sm:$0xff]   ;;  %v2389_v24 = vld [vmem:[#allocation7 + $0x28] ss:$16 sps:$4 sm:$0xff]   ;;  %v2368_v14 = vld [vmem:[#allocation7 + $0x80] ss:$16 sps:$4 sm:$0xff]  }
 0x2b0   :  { %v1338_v58 = vpack.c.bf16 %v358_v38, %v325_v46  ;;  %v233_v41 = vpop.permute.xlu1 %232  ;;  %v1339_v43 = vpack.c.bf16 %v359_v27, %v326_v37  ;;  %v139_v54 = vsel %vm137_vm13, %v3169_v16, %v132_v9  ;;  %v161_v44 = vmul.f32 %v157_v13, %v138_v6  ;;  %v2358_v16 = vld [vmem:[#allocation7 + $0xc4] ss:$16 sps:$4 sm:$0xff]   ;;  %v2374_v46 = vld [vmem:[#allocation7 + $0x60] ss:$16 sps:$4 sm:$0xff]   ;;  %v1411_v38 = vpop.f32.mrf.mxu0  ;;  %v2406_v5 = vld [vmem:[#allocation10 + $0x2c] ss:$16 sps:$4 sm:$0xff]  }
 0x2b1   :  { %v237_v47 = vsel %vm236_vm12, %v233_v41, %v3161_v15  ;;  %1748 = vmatpush1.bf16.msra.mxu0 %v2359_v3  ;;  %v238_v15 = vsel %vm236_vm12, %v3157_v23, %v233_v41  ;;  %v160_v53 = vmul.f32 %v153_v20, %v139_v54  ;;  %v2370_v35 = vld [vmem:[#allocation7 + $0x84] ss:$16 sps:$4 sm:$0xff]   ;;  %v2392_v56 = vld [vmem:[#allocation7] ss:$16 sps:$4 sm:$0xff]   ;;  %vm1851_vm0 = vcmask 261120  }
 0x2b2   :  { %1426 = vmatprep.subr.bf16.mxu1 %v1339_v43  ;;  %1749 = vmatprep.subr.bf16.mxu0 %v2367_v17  ;;  %v260_v18 = vmul.f32 %v256_v29, %v237_v47  ;;  %v259_v62 = vmul.f32 %v252_v49, %v238_v15  ;;  %v2376_v3 = vld [vmem:[#allocation7 + $0x64] ss:$16 sps:$4 sm:$0xff]   ;;  %v2380_v17 = vld [vmem:[#allocation7 + $0x40] ss:$16 sps:$4 sm:$0xff]   ;;  %v1413_v33 = vpop.f32.mrf.mxu0  ;;  %v2395_v49 = vld [vmem:[#allocation7 + $0x8] ss:$16 sps:$4 sm:$0xff]  }
 0x2b3   :  { %1427 = vmatpush1.bf16.msra.mxu1 %v1338_v58  ;;  %v2388_v40 = vld [vmem:[#allocation7 + $0x24] ss:$16 sps:$4 sm:$0xff]   ;;  %v2398_v12 = vld [vmem:[#allocation10 + $0x20] ss:$16 sps:$4 sm:$0xff]  }
 0x2b4   :  { %v167_v59 = vpop.permute.xlu1 %166  ;;  %2053 = vmatprep.subr.msk.bf16.mxu1 %vm3146_vm10, %v2052_v1  ;;  %v1326_v0 = vpack.c.bf16 %v259_v62, %v226_v52  ;;  %v1415_v41 = vpop.f32.mrf.mxu0  ;;  %v2403_v4 = vld [vmem:[#allocation10 + $0x4] ss:$16 sps:$4 sm:$0xff]   ;;  %v2409_v62 = vld [vmem:[#allocation10 + $0xc] ss:$16 sps:$4 sm:$0xff]  }
 0x2b5   :  { %v171_v23 = vsel %vm170_vm14, %v167_v59, %v3213_v57  ;;  %1750 = vmatpush1.bf16.msra.mxu0 %v2365_v51  ;;  %v172_v63 = vsel %vm170_vm14, %v3193_v28, %v167_v59  ;;  %v1327_v57 = vpack.c.bf16 %v260_v18, %v227_v2  ;;  %v2385_v28 = vld [vmem:[#allocation7 + $0x4c] ss:$16 sps:$4 sm:$0xff]   ;;  %v2394_v51 = vld [vmem:[#allocation7 + $0x4] ss:$16 sps:$4 sm:$0xff]  }
 0x2b6   :  { %1751 = vmatprep.subr.bf16.mxu0 %v2373_v48  ;;  %v194_v19 = vmul.f32 %v190_v50, %v171_v23  ;;  %v193_v55 = vmul.f32 %v186_v22, %v172_v63  ;;  %v1416_v47 = vpop.f32.mrf.mxu0  ;;  %v2400_v48 = vld [vmem:[#allocation10 + $0x24] ss:$16 sps:$4 sm:$0xff]   ;;  %v2401_v23 = vld [vmem:[#allocation10] ss:$16 sps:$4 sm:$0xff]   ;;  %v2407_v22 = vld [vmem:[#allocation10 + $0x8] ss:$16 sps:$4 sm:$0xff]  }
 0x2b7   :  { %2056 = vmatpush1.bf16.msk.msra.mxu1 %vm3146_vm10, %v2055_v61  ;;  %v2404_v61 = vld [vmem:[#allocation10 + $0x28] ss:$16 sps:$4 sm:$0xff]  }
 0x2b8   :  { %1430 = vmatprep.subr.bf16.mxu1 %v1327_v57  ;;  %v1321_v42 = vpack.c.bf16 %v194_v19, %v161_v44  ;;  %v1320_v60 = vpack.c.bf16 %v193_v55, %v160_v53 }
 0x2b9   :  { %1752 = vmatpush1.bf16.msra.mxu0 %v2371_v8  ;;  %v3418_v37 = vpop.permute.xlu0 %1352 }
 0x2ba   :  { %1753 = vmatprep.subr.bf16.mxu0 %v2379_v34  ;;  %v1412_v27 = vadd.f32 %v1411_v38, %v3418_v37  ;;  %v1414_v29 = vadd.f32 %v1413_v33, %v3418_v37 }
 0x2bb   :  { %1431 = vmatpush1.bf16.msra.mxu1 %v1326_v0  ;;  %v1947_v0 = vld [vmem:[#allocation2 + $0x8] sm:$0xff] }
 0x2bc   :  { %1432 = vmatprep.subr.bf16.mxu1 %v1321_v42  ;;  %v1500_v58 = vmax.f32 %v1412_v27, 0.0  ;;  %v1501_v43 = vmax.f32 %v1414_v29, 0.0  ;;  %1952 = vst [vmem:[#allocation11 + $0x38] sm:$0xf0] %v1947_v0 }
 0x2bd   :  { %1754 = vmatpush1.bf16.msra.mxu0 %v2377_v21  ;;  %v1941_v21 = vld [vmem:[#allocation2] sm:$0xff] }
 0x2be   :  { %1755 = vmatprep.subr.bf16.mxu0 %v2385_v28  ;;  %1506 = vst [vmem:[#allocation11] sm:$0xf] %v1500_v58  ;;  %1507 = vst [vmem:[#allocation11 + $0x8] sm:$0xf] %v1501_v43  ;;  %v1943_v55 = vcombine.low %v1941_v21, %v1941_v21 }
 0x2bf   :  { %1433 = vmatpush1.bf16.msra.mxu1 %v1320_v60  ;;  %1946 = vst [vmem:[#allocation11 + $0x18] sm:$0xf0] %v1941_v21 }
 0x2c0   :  { %1704 = vmatprep.subr.bf16.mxu1 %v2352_v7  ;;  %1945 = vst [vmem:[#allocation11 + $0x10] sm:$0xf0] %v1943_v55 }
 0x2c1   :  { %1756 = vmatpush1.bf16.msra.mxu0 %v2383_v10 }
 0x2c2   :  { %1757 = vmatprep.subr.bf16.mxu0 %v2391_v26  ;;  %2057 = vmatmul.mubr.msk.bf16.vlgmr.msra.gmra.mxu1 %vm1355_vm15, %v3239_v31  ;;  %v2382_v31 = vld [vmem:[#allocation7 + $0x44] ss:$16 sps:$4 sm:$0xff]  }
 0x2c3   :  { %1705 = vmatpush1.bf16.msra.mxu1 %v2350_v39  ;;  %1736 = vmatprep.mubr.bf16.mxu1 %v2567_v30 }
 0x2c4   :  { %1706 = vmatprep.subr.bf16.mxu1 %v2358_v16 }
 0x2c5   :  { %1758 = vmatpush1.bf16.msra.mxu0 %v2389_v24 }
 0x2c6   :  { %1759 = vmatprep.subr.bf16.mxu0 %v2397_v36 }
 0x2c7   :  { %1707 = vmatpush1.bf16.msra.mxu1 %v2356_v25 }
 0x2c8   :  { %1708 = vmatprep.subr.bf16.mxu1 %v2364_v11 }
 0x2c9   :  { %1760 = vmatpush1.bf16.msra.mxu0 %v2395_v49 }
 0x2cb   :  { %1709 = vmatpush1.bf16.msra.mxu1 %v2362_v32 }
 0x2cc   :  { %1710 = vmatprep.subr.bf16.mxu1 %v2370_v35 }
 0x2cf   :  { %1711 = vmatpush1.bf16.msra.mxu1 %v2368_v14 }
 0x2d0   :  { %1712 = vmatprep.subr.bf16.mxu1 %v2376_v3 }
 0x2d3   :  { %1713 = vmatpush1.bf16.msra.mxu1 %v2374_v46 }
 0x2d4   :  { %1714 = vmatprep.subr.bf16.mxu1 %v2382_v31 }
 0x2d7   :  { %1715 = vmatpush1.bf16.msra.mxu1 %v2380_v17 }
 0x2d8   :  { %1716 = vmatprep.subr.bf16.mxu1 %v2388_v40 }
 0x2db   :  { %1717 = vmatpush1.bf16.msra.mxu1 %v2386_v45 }
 0x2dc   :  { %1718 = vmatprep.subr.bf16.mxu1 %v2394_v51 }
 0x2df   :  { %1719 = vmatpush1.bf16.msra.mxu1 %v2392_v56 }
 0x2e0   :  { %1867 = vmatprep.subr.bf16.mxu1 %v2400_v48 }
 0x36c   :  { %v1493_v1 = vpop.f32.mrf.mxu0 }
 0x36d   :  { %v1494_v9 = vadd.f32 %v1493_v1, %v3418_v37 }
 0x36e   :  { %v1495_v15 = vpop.f32.mrf.mxu0 }
 0x36f   :  { %v1504_v18 = vmax.f32 %v1494_v9, 0.0  ;;  %v1496_v59 = vadd.f32 %v1495_v15, %v3418_v37 }
 0x370   :  { %v1497_v50 = vpop.f32.mrf.mxu0 }
 0x371   :  { %v1511_v13 = vpack.c.bf16 %v1504_v18, %v1504_v18  ;;  %v1505_v8 = vmax.f32 %v1496_v59, 0.0 }
 0x372   :  { %v1498_v2 = vpop.f32.mrf.mxu0 }
 0x373   :  { %1737 = vmatmul.mubr.bf16.vlgmr.msra.gmra.mxu1 %v1511_v13  ;;  %1778 = vmatmul.mubr.bf16.vlgmr.msra.gmra.mxu0 %v1511_v13  ;;  %v1802_v6 = vpack.c.bf16 %v1505_v8, %v1505_v8 }
 0x374   :  { %1868 = vmatpush1.bf16.msra.mxu1 %v2398_v12  ;;  %1887 = vmatprep.mubr.bf16.mxu1 %v2567_v30 }
 0x375   :  { %1869 = vmatprep.subr.bf16.mxu1 %v2403_v4 }
 0x378   :  { %1870 = vmatpush1.bf16.msra.mxu1 %v2401_v23 }
 0x379   :  { %1908 = vmatprep.subr.bf16.mxu1 %v2406_v5 }
 0x37b   :  { %2100 = vmatmul.mubr.msk.bf16.vlgmr.msra.gmra.mxu1 %vm1851_vm0, %v1802_v6 }
 0x37c   :  { %1909 = vmatpush1.bf16.msra.mxu1 %v2404_v61  ;;  %1928 = vmatprep.mubr.bf16.mxu1 %v2567_v30  ;;  %v1949_v30 = vcombine.low %v1947_v0, %v1947_v0 }
 0x37d   :  { %1910 = vmatprep.subr.bf16.mxu1 %v2409_v62 }
 0x37e   :  { %1951 = vst [vmem:[#allocation11 + $0x30] sm:$0xf0] %v1949_v30 }
 0x380   :  { %1911 = vmatpush1.bf16.msra.mxu1 %v2407_v22 }
 0x382   :  { %v1452_v34 = vpop.f32.mrf.mxu1 }
 0x383   :  { %2101 = vmatmul.mubr.msk.bf16.vlgmr.msra.gmra.mxu1 %vm1851_vm0, %v1802_v6  ;;  %v1453_v63 = vadd.f32 %v1452_v34, %v3418_v37 }
 0x384   :  { %v1454_v19 = vpop.f32.mrf.mxu1 }
 0x385   :  { %v1502_v57 = vmax.f32 %v1453_v63, 0.0  ;;  %v1455_v52 = vadd.f32 %v1454_v19, %v3418_v37 }
 0x386   :  { %v1456_v20 = vpop.f32.mrf.mxu1 }
 0x387   :  { %1509 = vst [vmem:[#allocation11 + $0x20] sm:$0xf] %v1502_v57  ;;  %v1503_v54 = vmax.f32 %v1455_v52, 0.0 }
 0x388   :  { %v1457_v44 = vpop.f32.mrf.mxu1 }
 0x389   :  { %1510 = vst [vmem:[#allocation11 + $0x28] sm:$0xf] %v1503_v54 }
 0x433   :  { %v1738_v28 = vpop.f32.mrf.mxu1  ;;  %v1779_v42 = vpop.f32.mrf.mxu0 }
 0x434   :  { %v1788_v53 = vrot.slane %v1738_v28, 4  ;;  %v1796_v7 = vrot.slane %v1779_v42, 4 }
 0x435   :  { %v1740_v10 = vpop.f32.mrf.mxu1  ;;  %v1781_v60 = vpop.f32.mrf.mxu0 }
 0x436   :  { %1792 = vst [vmem:[#allocation11] sm:$0xf0] %v1788_v53  ;;  %1800 = vst [vmem:[#allocation11 + $0x20] sm:$0xf0] %v1796_v7  ;;  %v1789_v26 = vrot.slane %v1740_v10, 4  ;;  %v1797_v39 = vrot.slane %v1781_v60, 4 }
 0x437   :  { %v1742_v16 = vpop.f32.mrf.mxu1  ;;  %v1783_v24 = vpop.f32.mrf.mxu0 }
 0x438   :  { %1793 = vst [vmem:[#allocation11 + $0x8] sm:$0xf0] %v1789_v26  ;;  %1801 = vst [vmem:[#allocation11 + $0x28] sm:$0xf0] %v1797_v39 }
 0x439   :  { %v1743_v25 = vpop.f32.mrf.mxu1  ;;  %v1784_v11 = vpop.f32.mrf.mxu0 }
 0x43b   :  { %v1889_v32 = vpop.f32.mrf.mxu1 }
 0x43c   :  { %1937 = vst [vmem:[#allocation11 + $0x10] sm:$0xf] %v1889_v32 }
 0x43d   :  { %v1891_v35 = vpop.f32.mrf.mxu1 }
 0x43e   :  { %1938 = vst [vmem:[#allocation11 + $0x18] sm:$0xf] %v1891_v35 }
 0x43f   :  { %v1893_v14 = vpop.f32.mrf.mxu1 }
 0x441   :  { %v1894_v3 = vpop.f32.mrf.mxu1 }
 0x443   :  { %v1930_v46 = vpop.f32.mrf.mxu1 }
 0x444   :  { %1939 = vst [vmem:[#allocation11 + $0x30] sm:$0xf] %v1930_v46 }
 0x445   :  { %v1932_v37 = vpop.f32.mrf.mxu1 }
 0x446   :  { %1940 = vst [vmem:[#allocation11 + $0x38] sm:$0xf] %v1932_v37 }
 0x447   :  { %v1934_v31 = vpop.f32.mrf.mxu1 }
 0x448   :  { %2525 = shalt.err (!%p2522_p1)
}
 0x449   :  { %1964 = dma.vmem_to_hbm [thread:$0]  %s1959_s18, 1024, %s3444_s10, [#allocation4], %s2548_s7, %s2548_s7, %s2549_s12   ;;  %v1935_v38 = vpop.f32.mrf.mxu1 }
 0x44a   :  { %2540 = dma.done.wait [#allocation4], 1024  }
 0x44b   :  { %2541 = vsyncadd [#allocation4], 4294966272 }
 0x44c   :  { %1968 = vsyncpa [#allocation3], 1 }
 0x44d   :  { %1969 = vsyncpa [#allocation6], 1 }
 0x44e   :  { %1970 = vsyncpa [#allocation9], 1 }
 0x44f   :  { %1971 = vsyncpa [#allocation4], 1 }

</bundles_post_ra>
